<compile_context>
chip_gen: v7x
topology: tpu7x:2x2x1
jax: 0.10.0
libtpu: 0.0.40
codegen_flags: <defaults>
</compile_context>

<pallas_src>
import math
import functools

import jax
import jax.numpy as jnp
from jax.experimental import pallas as pl
from jax.experimental.pallas import tpu as pltpu

_EPS = 1e-5


# --------------------------------------------------------------------------
# Pallas tiled matmul kernel (the conv hot path): bf16 x bf16 -> f32
# --------------------------------------------------------------------------
def _matmul_kernel(a_ref, b_ref, o_ref):
    o_ref[...] = jnp.dot(a_ref[...], b_ref[...],
                         preferred_element_type=jnp.float32)


def pallas_matmul(a, b, tm=256):
    """a: (M, K), b: (K, N) -> (M, N) float32.  Operands cast to bf16."""
    M, K = a.shape
    K2, N = b.shape
    assert K == K2
    a = a.astype(jnp.bfloat16)
    b = b.astype(jnp.bfloat16)

    # Row tile: multiple of 8 (or the full M when M < tm).  No padding of the
    # big activation matrix -- Pallas masks the partial edge block's stores,
    # and garbage rows only produce (masked) garbage output rows.
    tm_eff = tm if M >= tm else M
    # Column tile: full Cout (<=128 in this net) keeps a single lane-dense
    # block and avoids padding/slicing the output.
    tn = 128 if (N % 128 == 0) else N

    grid = (pl.cdiv(M, tm_eff), pl.cdiv(N, tn))
    return pl.pallas_call(
        _matmul_kernel,
        out_shape=jax.ShapeDtypeStruct((M, N), jnp.float32),
        grid_spec=pltpu.PrefetchScalarGridSpec(
            num_scalar_prefetch=0,
            grid=grid,
            in_specs=[pl.BlockSpec((tm_eff, K), lambda i, j: (i, 0)),
                      pl.BlockSpec((K, tn), lambda i, j: (0, j))],
            out_specs=pl.BlockSpec((tm_eff, tn), lambda i, j: (i, j))),
        compiler_params=pltpu.CompilerParams(
            dimension_semantics=("parallel", "parallel")),
    )(a, b)


# --------------------------------------------------------------------------
# Pallas softmax-over-disparity + disparity regression kernel
# (pixels on the 128-lane axis, disparity on sublanes -> lane-dense output)
# --------------------------------------------------------------------------
def _softmax_disp_kernel(x_ref, o_ref):
    x = x_ref[...]                                    # (D, tn) f32
    m = jnp.max(x, axis=0, keepdims=True)
    e = jnp.exp(x - m)
    s = jnp.sum(e, axis=0, keepdims=True)
    d = jax.lax.broadcasted_iota(jnp.float32, x.shape, 0)
    num = jnp.sum(e * d, axis=0, keepdims=True)
    o_ref[...] = num * pl.reciprocal(s, approx=True)


@jax.jit
def softmax_disparity_regression(cost):
    # cost: (N, D, H, W) -> (N, H, W); softmax over D then sum(p * d)
    N, D, H, W = cost.shape
    x = cost.astype(jnp.float32).transpose(1, 0, 2, 3).reshape(D, N * H * W)
    M = x.shape[1]
    tn = 512 if M >= 512 else M
    out = pl.pallas_call(
        _softmax_disp_kernel,
        out_shape=jax.ShapeDtypeStruct((1, M), jnp.float32),
        grid_spec=pltpu.PrefetchScalarGridSpec(
            num_scalar_prefetch=0,
            grid=(pl.cdiv(M, tn),),
            in_specs=[pl.BlockSpec((D, tn), lambda i: (0, i))],
            out_specs=pl.BlockSpec((1, tn), lambda i: (0, i))),
        compiler_params=pltpu.CompilerParams(
            dimension_semantics=("parallel",)),
    )(x)
    return out.reshape(N, H, W)


# --------------------------------------------------------------------------
# Conv / deconv lowering (channels-last im2col glue in JAX, GEMM in Pallas)
# --------------------------------------------------------------------------
def conv2d(x, w, stride=1, pad=1, bias=None):
    # x: (N, H, W, Cin), w: (Cout, Cin, kh, kw)   [PyTorch weight layout]
    N, H, W, C = x.shape
    Cout, Cin, kh, kw = w.shape
    xb = x.astype(jnp.bfloat16)
    xp = jnp.pad(xb, ((0, 0), (pad, pad), (pad, pad), (0, 0)))
    Ho = (H + 2 * pad - kh) // stride + 1
    Wo = (W + 2 * pad - kw) // stride + 1
    cols = [xp[:, dy:dy + stride * Ho:stride, dx:dx + stride * Wo:stride, :]
            for dy in range(kh) for dx in range(kw)]
    col = jnp.stack(cols, axis=3).reshape(N * Ho * Wo, kh * kw * C)
    wm = w.transpose(2, 3, 1, 0).reshape(kh * kw * Cin, Cout)
    out = pallas_matmul(col, wm).reshape(N, Ho, Wo, Cout)
    if bias is not None:
        out = out + bias
    return out


def conv3d(x, w, stride=1, pad=1, bias=None):
    # x: (N, D, H, W, Cin), w: (Cout, Cin, kd, kh, kw)   [PyTorch weight layout]
    N, D, H, W, C = x.shape
    Cout, Cin, kd, kh, kw = w.shape
    xb = x.astype(jnp.bfloat16)
    xp = jnp.pad(xb, ((0, 0), (pad, pad), (pad, pad), (pad, pad), (0, 0)))
    Do = (D + 2 * pad - kd) // stride + 1
    Ho = (H + 2 * pad - kh) // stride + 1
    Wo = (W + 2 * pad - kw) // stride + 1
    cols = [xp[:, dz:dz + stride * Do:stride,
               dy:dy + stride * Ho:stride,
               dx:dx + stride * Wo:stride, :]
            for dz in range(kd) for dy in range(kh) for dx in range(kw)]
    col = jnp.stack(cols, axis=4).reshape(N * Do * Ho * Wo, kd * kh * kw * C)
    wm = w.transpose(2, 3, 4, 1, 0).reshape(kd * kh * kw * Cin, Cout)
    out = pallas_matmul(col, wm).reshape(N, Do, Ho, Wo, Cout)
    if bias is not None:
        out = out + bias
    return out


def _phase_geometry(k, pad, phase):
    """Taps / input padding for one output phase of a stride-2 transposed conv."""
    taps = [t for t in range(k) if (phase + pad - t) % 2 == 0]
    pairs = sorted(((phase + pad - t) // 2, t) for t in taps)   # by offset asc
    offs = [o for o, _ in pairs]
    taps = [t for _, t in pairs]
    assert offs[0] <= 0, "unsupported transposed-conv geometry"
    left = -offs[0]
    right = max(0, offs[-1])
    return taps, left, right


def conv_transpose3d(x, w):
    """Phase-split (sub-pixel) ConvTranspose3d, stride=2, padding=(k-1)//2,
    output_padding=1 -> exactly doubles D/H/W.
    x: (N, D, H, W, Cin); w: (Cin, Cout, k, k, k)  [PyTorch layout]."""
    N, D, H, W, Cin = x.shape
    Cout = w.shape[1]
    k = w.shape[2]
    pad = (k - 1) // 2
    xb = x.astype(jnp.bfloat16)

    phase_results = []
    for pz in (0, 1):
        tz, lz, rz = _phase_geometry(k, pad, pz)
        for py in (0, 1):
            ty, ly, ry = _phase_geometry(k, pad, py)
            for px in (0, 1):
                tx, lx, rx = _phase_geometry(k, pad, px)
                xp = jnp.pad(xb, ((0, 0), (lz, rz), (ly, ry), (lx, rx), (0, 0)))
                cols = [xp[:, ez:ez + D, ey:ey + H, ex:ex + W, :]
                        for ez in range(len(tz))
                        for ey in range(len(ty))
                        for ex in range(len(tx))]
                col = jnp.stack(cols, axis=4)
                col = col.reshape(N * D * H * W, len(cols) * Cin)
                sw = w[:, :, tz, :, :][:, :, :, ty, :][:, :, :, :, tx]
                sw = sw.transpose(2, 3, 4, 0, 1).reshape(len(cols) * Cin, Cout)
                res = pallas_matmul(col, sw)
                phase_results.append(res.reshape(N, D, H, W, Cout))

    out = jnp.stack(phase_results, axis=0).reshape(2, 2, 2, N, D, H, W, Cout)
    out = out.transpose(3, 4, 0, 5, 1, 6, 2, 7)
    return out.reshape(N, 2 * D, 2 * H, 2 * W, Cout)


# --------------------------------------------------------------------------
# BatchNorm (training-mode batch statistics, gamma=1, beta=0) and ReLU
# --------------------------------------------------------------------------
def relu(x):
    return jnp.maximum(x, 0.0)


def bn2d(x):
    mean = jnp.mean(x, axis=(0, 1, 2), keepdims=True)
    var = jnp.mean(jnp.square(x - mean), axis=(0, 1, 2), keepdims=True)
    return (x - mean) * jax.lax.rsqrt(var + _EPS)


def bn3d(x):
    mean = jnp.mean(x, axis=(0, 1, 2, 3), keepdims=True)
    var = jnp.mean(jnp.square(x - mean), axis=(0, 1, 2, 3), keepdims=True)
    return (x - mean) * jax.lax.rsqrt(var + _EPS)


# --------------------------------------------------------------------------
# Jitted layer helpers (fuse BN/ReLU glue; jit cache dedups repeated shapes)
# --------------------------------------------------------------------------
@functools.partial(jax.jit, static_argnames=("stride", "act"))
def convbn3d(x, w, stride=1, act=False):
    y = bn3d(conv3d(x, w, stride=stride, pad=1))
    return relu(y) if act else y


@jax.jit
def conv3d_bias(x, w, b):
    return conv3d(x, w, stride=1, pad=1, bias=b)


@jax.jit
def deconv_bn(x, w):
    return bn3d(conv_transpose3d(x, w))


# TODO(synk): `sb.feature_extraction` (PSMNet SPP feature net) source is not
# provided with the module; using a compact convbn stack with the same output
# contract (N, H/4, W/4, 32).
@jax.jit
def feature_extraction(w1, w2, w3, w4, x):
    x = relu(bn2d(conv2d(x, w1, stride=2, pad=1)))
    x = relu(bn2d(conv2d(x, w2, stride=1, pad=1)))
    x = relu(bn2d(conv2d(x, w3, stride=2, pad=1)))
    return conv2d(x, w4, stride=1, pad=1)


@functools.partial(jax.jit, static_argnames=("d4",))
def build_cost_volume(ref, tgt, d4):
    # ref, tgt: (N, H, W, C) -> cost (N, d4, H, W, 2C) channels-last
    N, H, W, C = ref.shape
    w_idx = jnp.arange(W)
    d_idx = jnp.arange(d4)
    mask = (w_idx[None, :] >= d_idx[:, None]).astype(ref.dtype)   # (d4, W)
    ref_part = ref[:, None, :, :, :] * mask[None, :, None, :, None]
    tgt_pad = jnp.pad(tgt, ((0, 0), (0, 0), (d4 - 1, 0), (0, 0)))
    tgt_part = jnp.stack(
        [tgt_pad[:, :, d4 - 1 - d: d4 - 1 - d + W, :] for d in range(d4)],
        axis=1)                                                   # (N,d4,H,W,C)
    return jnp.concatenate([ref_part, tgt_part], axis=-1)


# --------------------------------------------------------------------------
# Parameters (deterministic init mirroring the module's __init__)
# --------------------------------------------------------------------------
def init_params(key):
    keys = iter(jax.random.split(key, 64))

    def conv_w(cout, cin, *k):
        n = cout * math.prod(k)
        std = math.sqrt(2.0 / n)
        return std * jax.random.normal(next(keys), (cout, cin) + tuple(k),
                                       jnp.float32)

    def deconv_w(cin, cout, *k):
        n = cout * math.prod(k)
        std = math.sqrt(2.0 / n)
        return std * jax.random.normal(next(keys), (cin, cout) + tuple(k),
                                       jnp.float32)

    def bias_w(cout, fan_in):
        bound = 1.0 / math.sqrt(fan_in)
        return jax.random.uniform(next(keys), (cout,), jnp.float32,
                                  -bound, bound)

    p = {
        # feature extraction
        "fe1_w": conv_w(32, 3, 3, 3),
        "fe2_w": conv_w(32, 32, 3, 3),
        "fe3_w": conv_w(32, 32, 3, 3),
        "fe4_w": conv_w(32, 32, 3, 3),
        # 3D conv stacks
        "dres0_w": conv_w(32, 64, 3, 3, 3),
        "dres1a_w": conv_w(32, 32, 3, 3, 3),
        "dres1b_w": conv_w(32, 32, 3, 3, 3),
        "dres2a_w": conv_w(32, 32, 3, 3, 3),
        "dres2b_w": conv_w(32, 32, 3, 3, 3),
        "dres3a_w": conv_w(64, 32, 3, 3, 3),
        "dres3b_w": conv_w(64, 64, 3, 3, 3),
        "dres4a_w": conv_w(64, 64, 3, 3, 3),
        "dres4b_w": conv_w(64, 64, 3, 3, 3),
        "conv1_1_w": conv_w(32, 32, 3, 3, 3),
        "conv2_1_w": conv_w(32, 32, 3, 3, 3),
        "dres5_w": conv_w(32, 64, 3, 3, 3),
        "classif1_a_w": conv_w(64, 128, 3, 3, 3),
        "classif1_b_w": conv_w(32, 64, 3, 3, 3),
        "classif1_b_b": bias_w(32, 64 * 27),
        "classif2_a_w": conv_w(64, 128, 3, 3, 3),
        "classif2_b_w": conv_w(32, 64, 3, 3, 3),
        "classif2_b_b": bias_w(32, 64 * 27),
        # transposed convs (deconv6_1 / deconv6_2 are unused in forward)
        "deconv3_1_w": deconv_w(64, 64, 3, 3, 3),
        "deconv4_1_w": deconv_w(64, 32, 3, 3, 3),
        "deconv5_1_w": deconv_w(32, 32, 3, 3, 3),
        "deconv3_2_w": deconv_w(64, 64, 5, 5, 5),
        "deconv4_2_w": deconv_w(64, 32, 5, 5, 5),
        "deconv5_2_w": deconv_w(32, 32, 5, 5, 5),
        "deconv1_w": deconv_w(32, 32, 3, 3, 3),
        "deconv2_w": deconv_w(32, 1, 3, 3, 3),
    }
    return p


# --------------------------------------------------------------------------
# CFPNet_s forward
# --------------------------------------------------------------------------
def cfpnet_forward(params, left, right, maxdisp):
    p = params
    # public API is NCHW; everything internal is channels-last.
    left_cl = jnp.transpose(left, (0, 2, 3, 1))
    right_cl = jnp.transpose(right, (0, 2, 3, 1))

    fe_w = (p["fe1_w"], p["fe2_w"], p["fe3_w"], p["fe4_w"])
    ref_fea = feature_extraction(*fe_w, left_cl)       # (N, H/4, W/4, 32)
    tgt_fea = feature_extraction(*fe_w, right_cl)

    D4 = maxdisp // 4
    cost = build_cost_volume(ref_fea.astype(jnp.bfloat16),
                             tgt_fea.astype(jnp.bfloat16), d4=D4)

    cost0 = convbn3d(cost, p["dres0_w"], act=True)
    cost1 = convbn3d(convbn3d(cost0, p["dres1a_w"], act=True),
                     p["dres1b_w"]) + cost0
    cost2 = convbn3d(convbn3d(cost1, p["dres2a_w"], stride=2, act=True),
                     p["dres2b_w"])
    cost3 = convbn3d(convbn3d(cost2, p["dres3a_w"], stride=2, act=True),
                     p["dres3b_w"])
    cost4 = convbn3d(convbn3d(cost3, p["dres4a_w"], stride=2, act=True),
                     p["dres4b_w"])

    # conv1_1 / conv2_1 share the same input -> one GEMM with Cout=64
    # (per-channel BN is unchanged by the concat).
    w_1121 = jnp.concatenate([p["conv1_1_w"], p["conv2_1_w"]], axis=0)
    F_1121 = convbn3d(cost1, w_1121, act=True)
    F1_1, F2_1 = F_1121[..., :32], F_1121[..., 32:]

    F1_2 = deconv_bn(cost2, p["deconv5_1_w"])
    F1_3 = deconv_bn(deconv_bn(cost3, p["deconv4_1_w"]), p["deconv5_1_w"])
    F1_4 = deconv_bn(deconv_bn(deconv_bn(cost4, p["deconv3_1_w"]),
                               p["deconv4_1_w"]), p["deconv5_1_w"])

    F2_2 = deconv_bn(cost2, p["deconv5_2_w"])
    F2_3 = deconv_bn(deconv_bn(cost3, p["deconv4_2_w"]), p["deconv5_2_w"])
    F2_4 = deconv_bn(deconv_bn(deconv_bn(cost4, p["deconv3_2_w"]),
                               p["deconv4_2_w"]), p["deconv5_2_w"])

    F_total1 = jnp.concatenate([F1_1, F1_2, F1_3, F1_4], axis=-1)
    F_total1 = conv3d_bias(convbn3d(F_total1, p["classif1_a_w"], act=True),
                           p["classif1_b_w"], p["classif1_b_b"])
    F_total2 = jnp.concatenate([F2_1, F2_2, F2_3, F2_4], axis=-1)
    F_total2 = conv3d_bias(convbn3d(F_total2, p["classif2_a_w"], act=True),
                           p["classif2_b_w"], p["classif2_b_b"])

    F_final = jnp.concatenate([F_total1, F_total2], axis=-1)
    out1 = convbn3d(F_final, p["dres5_w"], act=True)
    out2 = deconv_bn(out1, p["deconv1_w"])
    out3 = deconv_bn(out2, p["deconv2_w"])             # (N, maxdisp, H, W, 1)

    Hi, Wi = left.shape[2], left.shape[3]
    target = (out3.shape[0], maxdisp, Hi, Wi, 1)
    if out3.shape != target:
        out3 = jax.image.resize(out3, target, method="trilinear")
    cost_up = jnp.squeeze(out3, axis=-1)               # (N, maxdisp, H, W)
    pred = softmax_disparity_regression(cost_up)       # (N, H, W)
    return pred


# --------------------------------------------------------------------------
if __name__ == "__main__":
    key = jax.random.PRNGKey(0)
    pkey, lkey, rkey = jax.random.split(key, 3)

    maxdisp = 32                    # divisible by 32 so the 3 stride-2 stages
    N, H, W = 2, 32, 32             # and their deconvs round-trip exactly

    params = init_params(pkey)
    left = jax.random.normal(lkey, (N, 3, H, W), jnp.float32)
    right = jax.random.normal(rkey, (N, 3, H, W), jnp.float32)

    pred = cfpnet_forward(params, left, right, maxdisp)
    pred = jax.block_until_ready(pred)

    assert pred.shape == (N, H, W), pred.shape
    assert bool(jnp.all(jnp.isfinite(pred)))
    print("KERNEL_OK")
</pallas_src>

<mosaic_0001>
module attributes {stable_mosaic.version = 11 : i64} {
  func.func @_matmul_kernel(%arg0: i32, %arg1: i32, %arg2: memref<256x27xbf16, #tpu.memory_space<vmem>>, %arg3: memref<27x32xbf16, #tpu.memory_space<vmem>>, %arg4: memref<256x32xf32, #tpu.memory_space<vmem>>) attributes {dimension_semantics = [#tpu.dimension_semantics<parallel>, #tpu.dimension_semantics<parallel>], iteration_bounds = array<i64: 2, 1>, scalar_prefetch = 0 : i64, scratch_operands = 0 : i64, tpu.core_type = #tpu.core_type<tc>, window_params = [{transform_indices = @transform_0, window_bounds = array<i64: 256, 27>}, {transform_indices = @transform_1, window_bounds = array<i64: 27, 32>}, {transform_indices = @transform_2, window_bounds = array<i64: 256, 32>}]} {
    %c0 = arith.constant 0 : index
    %c0_0 = arith.constant 0 : index
    %0 = vector.load %arg2[%c0, %c0_0] : memref<256x27xbf16, #tpu.memory_space<vmem>>, vector<256x27xbf16>
    %c0_1 = arith.constant 0 : index
    %c0_2 = arith.constant 0 : index
    %1 = vector.load %arg3[%c0_1, %c0_2] : memref<27x32xbf16, #tpu.memory_space<vmem>>, vector<27x32xbf16>
    %cst = arith.constant dense<0.000000e+00> : vector<256x32xf32>
    %2 = tpu.matmul %0, %1, %cst {dimension_numbers = #tpu.dot_dimension_numbers<[1], [0], [0], [1], [0, 0, 1, 1], [], []>} : vector<256x27xbf16>, vector<27x32xbf16>, vector<256x32xf32> -> vector<256x32xf32>
    %c0_3 = arith.constant 0 : index
    %c0_4 = arith.constant 0 : index
    %3 = vector.load %arg4[%c0_3, %c0_4] : memref<256x32xf32, #tpu.memory_space<vmem>>, vector<256x32xf32>
    tpu.vector_store %arg4[%c0_3, %c0_4], %2 {strides = array<i32>} : memref<256x32xf32, #tpu.memory_space<vmem>>, vector<256x32xf32>,
    return
  }
  func.func @transform_0(%arg0: i32, %arg1: i32) -> (i32, i32) {
    %c0_i32 = arith.constant 0 : i32
    %c0_i32_0 = arith.constant 0 : i32
    return %arg0, %c0_i32 : i32, i32
  }
  func.func @transform_1(%arg0: i32, %arg1: i32) -> (i32, i32) {
    %c0_i32 = arith.constant 0 : i32
    %c0_i32_0 = arith.constant 0 : i32
    return %c0_i32, %arg1 : i32, i32
  }
  func.func @transform_2(%arg0: i32, %arg1: i32) -> (i32, i32) {
    %c0_i32 = arith.constant 0 : i32
    return %arg0, %arg1 : i32, i32
  }
}

module attributes {stable_mosaic.version = 11 : i64} {
  func.func @_matmul_kernel(%arg0: i32, %arg1: i32, %arg2: memref<256x288xbf16, #tpu.memory_space<vmem>>, %arg3: memref<288x32xbf16, #tpu.memory_space<vmem>>, %arg4: memref<256x32xf32, #tpu.memory_space<vmem>>) attributes {dimension_semantics = [#tpu.dimension_semantics<parallel>, #tpu.dimension_semantics<parallel>], iteration_bounds = array<i64: 2, 1>, scalar_prefetch = 0 : i64, scratch_operands = 0 : i64, tpu.core_type = #tpu.core_type<tc>, window_params = [{transform_indices = @transform_0, window_bounds = array<i64: 256, 288>}, {transform_indices = @transform_1, window_bounds = array<i64: 288, 32>}, {transform_indices = @transform_2, window_bounds = array<i64: 256, 32>}]} {
    %c0 = arith.constant 0 : index
    %c0_0 = arith.constant 0 : index
    %0 = vector.load %arg2[%c0, %c0_0] : memref<256x288xbf16, #tpu.memory_space<vmem>>, vector<256x288xbf16>
    %c0_1 = arith.constant 0 : index
    %c0_2 = arith.constant 0 : index
    %1 = vector.load %arg3[%c0_1, %c0_2] : memref<288x32xbf16, #tpu.memory_space<vmem>>, vector<288x32xbf16>
    %cst = arith.constant dense<0.000000e+00> : vector<256x32xf32>
    %2 = tpu.matmul %0, %1, %cst {dimension_numbers = #tpu.dot_dimension_numbers<[1], [0], [0], [1], [0, 0, 1, 1], [], []>} : vector<256x288xbf16>, vector<288x32xbf16>, vector<256x32xf32> -> vector<256x32xf32>
    %c0_3 = arith.constant 0 : index
    %c0_4 = arith.constant 0 : index
    %3 = vector.load %arg4[%c0_3, %c0_4] : memref<256x32xf32, #tpu.memory_space<vmem>>, vector<256x32xf32>
    tpu.vector_store %arg4[%c0_3, %c0_4], %2 {strides = array<i32>} : memref<256x32xf32, #tpu.memory_space<vmem>>, vector<256x32xf32>,
    return
  }
  func.func @transform_0(%arg0: i32, %arg1: i32) -> (i32, i32) {
    %c0_i32 = arith.constant 0 : i32
    %c0_i32_0 = arith.constant 0 : i32
    return %arg0, %c0_i32 : i32, i32
  }
  func.func @transform_1(%arg0: i32, %arg1: i32) -> (i32, i32) {
    %c0_i32 = arith.constant 0 : i32
    %c0_i32_0 = arith.constant 0 : i32
    return %c0_i32, %arg1 : i32, i32
  }
  func.func @transform_2(%arg0: i32, %arg1: i32) -> (i32, i32) {
    %c0_i32 = arith.constant 0 : i32
    return %arg0, %arg1 : i32, i32
  }
}

module attributes {stable_mosaic.version = 11 : i64} {
  func.func @_matmul_kernel(%arg0: i32, %arg1: i32, %arg2: memref<128x288xbf16, #tpu.memory_space<vmem>>, %arg3: memref<288x32xbf16, #tpu.memory_space<vmem>>, %arg4: memref<128x32xf32, #tpu.memory_space<vmem>>) attributes {dimension_semantics = [#tpu.dimension_semantics<parallel>, #tpu.dimension_semantics<parallel>], iteration_bounds = array<i64: 1, 1>, scalar_prefetch = 0 : i64, scratch_operands = 0 : i64, tpu.core_type = #tpu.core_type<tc>, window_params = [{transform_indices = @transform_0, window_bounds = array<i64: 128, 288>}, {transform_indices = @transform_1, window_bounds = array<i64: 288, 32>}, {transform_indices = @transform_2, window_bounds = array<i64: 128, 32>}]} {
    %c0 = arith.constant 0 : index
    %c0_0 = arith.constant 0 : index
    %0 = vector.load %arg2[%c0, %c0_0] : memref<128x288xbf16, #tpu.memory_space<vmem>>, vector<128x288xbf16>
    %c0_1 = arith.constant 0 : index
    %c0_2 = arith.constant 0 : index
    %1 = vector.load %arg3[%c0_1, %c0_2] : memref<288x32xbf16, #tpu.memory_space<vmem>>, vector<288x32xbf16>
    %cst = arith.constant dense<0.000000e+00> : vector<128x32xf32>
    %2 = tpu.matmul %0, %1, %cst {dimension_numbers = #tpu.dot_dimension_numbers<[1], [0], [0], [1], [0, 0, 1, 1], [], []>} : vector<128x288xbf16>, vector<288x32xbf16>, vector<128x32xf32> -> vector<128x32xf32>
    %c0_3 = arith.constant 0 : index
    %c0_4 = arith.constant 0 : index
    %3 = vector.load %arg4[%c0_3, %c0_4] : memref<128x32xf32, #tpu.memory_space<vmem>>, vector<128x32xf32>
    tpu.vector_store %arg4[%c0_3, %c0_4], %2 {strides = array<i32>} : memref<128x32xf32, #tpu.memory_space<vmem>>, vector<128x32xf32>,
    return
  }
  func.func @transform_0(%arg0: i32, %arg1: i32) -> (i32, i32) {
    %c0_i32 = arith.constant 0 : i32
    %c0_i32_0 = arith.constant 0 : i32
    return %arg0, %c0_i32 : i32, i32
  }
  func.func @transform_1(%arg0: i32, %arg1: i32) -> (i32, i32) {
    %c0_i32 = arith.constant 0 : i32
    %c0_i32_0 = arith.constant 0 : i32
    return %c0_i32, %arg1 : i32, i32
  }
  func.func @transform_2(%arg0: i32, %arg1: i32) -> (i32, i32) {
    %c0_i32 = arith.constant 0 : i32
    return %arg0, %arg1 : i32, i32
  }
}

module attributes {stable_mosaic.version = 11 : i64} {
  func.func @_matmul_kernel(%arg0: i32, %arg1: i32, %arg2: memref<128x288xbf16, #tpu.memory_space<vmem>>, %arg3: memref<288x32xbf16, #tpu.memory_space<vmem>>, %arg4: memref<128x32xf32, #tpu.memory_space<vmem>>) attributes {dimension_semantics = [#tpu.dimension_semantics<parallel>, #tpu.dimension_semantics<parallel>], iteration_bounds = array<i64: 1, 1>, scalar_prefetch = 0 : i64, scratch_operands = 0 : i64, tpu.core_type = #tpu.core_type<tc>, window_params = [{transform_indices = @transform_0, window_bounds = array<i64: 128, 288>}, {transform_indices = @transform_1, window_bounds = array<i64: 288, 32>}, {transform_indices = @transform_2, window_bounds = array<i64: 128, 32>}]} {
    %c0 = arith.constant 0 : index
    %c0_0 = arith.constant 0 : index
    %0 = vector.load %arg2[%c0, %c0_0] : memref<128x288xbf16, #tpu.memory_space<vmem>>, vector<128x288xbf16>
    %c0_1 = arith.constant 0 : index
    %c0_2 = arith.constant 0 : index
    %1 = vector.load %arg3[%c0_1, %c0_2] : memref<288x32xbf16, #tpu.memory_space<vmem>>, vector<288x32xbf16>
    %cst = arith.constant dense<0.000000e+00> : vector<128x32xf32>
    %2 = tpu.matmul %0, %1, %cst {dimension_numbers = #tpu.dot_dimension_numbers<[1], [0], [0], [1], [0, 0, 1, 1], [], []>} : vector<128x288xbf16>, vector<288x32xbf16>, vector<128x32xf32> -> vector<128x32xf32>
    %c0_3 = arith.constant 0 : index
    %c0_4 = arith.constant 0 : index
    %3 = vector.load %arg4[%c0_3, %c0_4] : memref<128x32xf32, #tpu.memory_space<vmem>>, vector<128x32xf32>
    tpu.vector_store %arg4[%c0_3, %c0_4], %2 {strides = array<i32>} : memref<128x32xf32, #tpu.memory_space<vmem>>, vector<128x32xf32>,
    return
  }
  func.func @transform_0(%arg0: i32, %arg1: i32) -> (i32, i32) {
    %c0_i32 = arith.constant 0 : i32
    %c0_i32_0 = arith.constant 0 : i32
    return %arg0, %c0_i32 : i32, i32
  }
  func.func @transform_1(%arg0: i32, %arg1: i32) -> (i32, i32) {
    %c0_i32 = arith.constant 0 : i32
    %c0_i32_0 = arith.constant 0 : i32
    return %c0_i32, %arg1 : i32, i32
  }
  func.func @transform_2(%arg0: i32, %arg1: i32) -> (i32, i32) {
    %c0_i32 = arith.constant 0 : i32
    return %arg0, %arg1 : i32, i32
  }
}

</mosaic_0001>

<bundles_post_ra>
// kernel: feature_extraction.4
= control target key start
LH: loop header
LB: loop body
LE: loop exit
PB: predicated region body
PF: predicated region fallthrough
CT: control target
= control target key end

     0   :  { %s839_s9 = smov 0   ;;  %s841_s10 = smov 0   ;;  %s982_s0 = inlined_call_operand.vmem [shape: bf16[512,27], index: 0, kind: input, shape index: {}]   ;;  %s983_s1 = inlined_call_operand.vmem [shape: bf16[27,32], index: 1, kind: input, shape index: {}]   ;;  %s984_s2 = inlined_call_operand.vmem [shape: f32[512,32], index: 2, kind: output, shape index: {}]  }
   0x1   :  { %s843_s11 = smov 0  }
   0x2 LB: > { %s24_s12 = sadd.s32 1, %s817_s10  ;;  %p657_p0 = scmp.ge.s32.totalorder %s821_s11, 1  ;;  %s821_s11 = sphi %s843_s11, %s12_s11   ;;  %s817_s10 = sphi %s841_s10, %s986_s10   ;;  %s813_s9 = sphi %s839_s9, %s985_s9  }
   0x3   : > { %p26_p1 = scmp.ge.s32.totalorder %s24_s12, 2  ;;  %p136_p2 = scmp.lt.s32.totalorder %s821_s11, 3 }
   0x5   : > { %s988_s12 = smov (%p26_p1, %s24_s12), 0  ;;  %p137_p3 = pnand %p657_p0, %p136_p2 }
   0x6   : > { %v781_v0 = vld [vmem:[%s983_s1] sm:$0xff] (!%p137_p3)   ;;  %vm361_vm0 = vcmask (!%p137_p3), 1044480   ;;  %v782_v1 = vld [vmem:[%s983_s1 + $0x8] sm:$0x3f] (!%p137_p3)   ;;  %vm362_vm1 = vcmask (!%p137_p3), 1045504   ;;  %s658_s17 = sshll.u32 (!%p137_p3), %s813_s9, 5 }
   0x7   : > { %140 = sbr.rel (%p137_p3) target bundleno = 260 (0x104), region = 28  ;;  %716 = vmatprep.subr.bf16.mxu0 (!%p137_p3), %v781_v0  ;;  %752 = vmatprep.subr.bf16.mxu1 (!%p137_p3), %v781_v0  ;;  %v823_v2 = vmov (!%p137_p3), 65535   ;;  %p166_p4 = scmp.lt.s32.totalorder (!%p137_p3), %s658_s17, 63  ;;  %vm312_vm2 = vcmask (!%p137_p3), 220160   ;;  %vm529_vm3 = vcmask (!%p137_p3), 261120  }
   0x8   : > { %717 = vmatpush3.bf16.msra.mxu0 (!%p137_p3), %v781_v0  ;;  %754 = vmatpush3.bf16.msra.mxu1 (!%p137_p3), %v781_v0  ;;  %v363_v3 = vsel (!%p137_p3), %vm361_vm0, 4294967295, %v823_v2 }
   0x9   : > { %v364_v4 = vsel (!%p137_p3), %vm362_vm1, %v363_v3, 0 }
   0xa   : > { %v366_v5 = vand.u32 (!%p137_p3), %v782_v1, %v364_v4 }
   0xc   : > { %718 = vmatprep.subr.bf16.mxu0 (!%p137_p3), %v366_v5  ;;  %753 = vmatprep.subr.bf16.mxu1 (!%p137_p3), %v366_v5 }
   0xd   : > { %719 = vmatpush3.bf16.msra.mxu0 (!%p137_p3), %v366_v5  ;;  %755 = vmatpush3.bf16.msra.mxu1 (!%p137_p3), %v366_v5 }
   0xe   : > { %s990_s17 = smov (!%p166_p4, %s658_s17), 63 }
   0xf   : > { %s659_s18 = sshll.u32 %s990_s17, 2  ;;  %s661_s22 = sshll.u32 %s990_s17, 3 }
  0x10   : > { %s869_s21 = scalar_lea.vmem %s982_s0, %s659_s18  ;;  %s907_s25 = scalar_lea.vmem %s984_s2, %s661_s22 }
  0x11   : > { %v783_v6 = vld [vmem:[%s869_s21] sm:$0xff]   ;;  %v785_v8 = vld [vmem:[%s869_s21 + $0x8] sm:$0xff]   ;;  %v787_v10 = vld [vmem:[%s869_s21 + $0x10] sm:$0xff]  }
  0x12   : > { %v784_v7 = vld [vmem:[%s869_s21 + $0x40] sm:$0xff]   ;;  %720 = vmatprep.mubr.msk.bf16.mxu0 %vm312_vm2, %v783_v6  ;;  %v786_v9 = vld [vmem:[%s869_s21 + $0x48] sm:$0xff]   ;;  %v788_v11 = vld [vmem:[%s869_s21 + $0x50] sm:$0xff]  }
  0x13   : > { %736 = vmatprep.mubr.msk.bf16.mxu1 %vm312_vm2, %v784_v7  ;;  %721 = vmatmul.mubr.msk.bf16.vlgmr.msra.gmra.mrb[0].mxu0 %vm312_vm2, %v785_v8  ;;  %v789_v12 = vld [vmem:[%s869_s21 + $0x18] sm:$0xff]   ;;  %v791_v14 = vld [vmem:[%s869_s21 + $0x20] sm:$0xff]   ;;  %v793_v16 = vld [vmem:[%s869_s21 + $0x28] sm:$0xff]  }
  0x14   : > { %737 = vmatmul.mubr.msk.bf16.vlgmr.msra.gmra.mrb[0].mxu1 %vm312_vm2, %v786_v9  ;;  %724 = vmatprep.mubr.msk.bf16.mxu0 %vm312_vm2, %v787_v10  ;;  %v790_v13 = vld [vmem:[%s869_s21 + $0x58] sm:$0xff]   ;;  %v792_v15 = vld [vmem:[%s869_s21 + $0x60] sm:$0xff]   ;;  %v794_v17 = vld [vmem:[%s869_s21 + $0x68] sm:$0xff]  }
  0x15   : > { %740 = vmatprep.mubr.msk.bf16.mxu1 %vm312_vm2, %v788_v11  ;;  %v795_v18 = vld [vmem:[%s869_s21 + $0x30] sm:$0xff]   ;;  %v797_v20 = vld [vmem:[%s869_s21 + $0x38] sm:$0xff]  }
  0x16   : > { %v796_v19 = vld [vmem:[%s869_s21 + $0x70] sm:$0xff]   ;;  %v798_v21 = vld [vmem:[%s869_s21 + $0x78] sm:$0xff]  }
  0x1b   : > { %725 = vmatmul.mubr.msk.bf16.gmra.mrb[4].mxu0 %vm312_vm2, %v789_v12 }
  0x1c   : > { %741 = vmatmul.mubr.msk.bf16.gmra.mrb[4].mxu1 %vm312_vm2, %v790_v13  ;;  %728 = vmatprep.mubr.msk.bf16.mxu0 %vm312_vm2, %v791_v14 }
  0x1d   : > { %744 = vmatprep.mubr.msk.bf16.mxu1 %vm312_vm2, %v792_v15 }
  0x23   : > { %729 = vmatmul.mubr.msk.bf16.gmra.mrb[8].mxu0 %vm312_vm2, %v793_v16 }
  0x24   : > { %745 = vmatmul.mubr.msk.bf16.gmra.mrb[8].mxu1 %vm312_vm2, %v794_v17  ;;  %732 = vmatprep.mubr.msk.bf16.mxu0 %vm312_vm2, %v795_v18 }
  0x25   : > { %748 = vmatprep.mubr.msk.bf16.mxu1 %vm312_vm2, %v796_v19 }
  0x2b   : > { %733 = vmatmul.mubr.msk.bf16.gmra.mrb[12].mxu0 %vm312_vm2, %v797_v20 }
  0x2c   : > { %749 = vmatmul.mubr.msk.bf16.gmra.mrb[12].mxu1 %vm312_vm2, %v798_v21 }
  0xe6   : > { %v722_v22 = vpop.f32.mrb[0].mxu0 }
  0xe7   : > { %532 = vst.msk [vmem:[%s907_s25 + $0x10] sm:$0xff] %vm529_vm3, %v722_v22  ;;  %v738_v23 = vpop.f32.mrb[0].mxu1  ;;  %v402_v24 = vpop.f32.mrb[1].mxu0 }
  0xe8   : > { %548 = vst.msk [vmem:[%s907_s25 + $0x90] sm:$0xff] %vm529_vm3, %v738_v23  ;;  %530 = vst.msk [vmem:[%s907_s25] sm:$0xff] %vm529_vm3, %v402_v24  ;;  %v466_v25 = vpop.f32.mrb[1].mxu1  ;;  %v723_v26 = vpop.f32.mrb[2].mxu0 }
  0xe9   : > { %546 = vst.msk [vmem:[%s907_s25 + $0x80] sm:$0xff] %vm529_vm3, %v466_v25  ;;  %533 = vst.msk [vmem:[%s907_s25 + $0x18] sm:$0xff] %vm529_vm3, %v723_v26  ;;  %v739_v27 = vpop.f32.mrb[2].mxu1  ;;  %v405_v28 = vpop.f32.mrb[3].mxu0 }
  0xea   : > { %549 = vst.msk [vmem:[%s907_s25 + $0x98] sm:$0xff] %vm529_vm3, %v739_v27  ;;  %531 = vst.msk [vmem:[%s907_s25 + $0x8] sm:$0xff] %vm529_vm3, %v405_v28  ;;  %v469_v29 = vpop.f32.mrb[3].mxu1 }
  0xeb   : > { %547 = vst.msk [vmem:[%s907_s25 + $0x88] sm:$0xff] %vm529_vm3, %v469_v29 }
  0xee   : > { %v726_v30 = vpop.f32.mrb[4].mxu0 }
  0xef   : > { %536 = vst.msk [vmem:[%s907_s25 + $0x30] sm:$0xff] %vm529_vm3, %v726_v30  ;;  %v742_v31 = vpop.f32.mrb[4].mxu1  ;;  %v418_v32 = vpop.f32.mrb[5].mxu0 }
  0xf0   : > { %552 = vst.msk [vmem:[%s907_s25 + $0xb0] sm:$0xff] %vm529_vm3, %v742_v31  ;;  %534 = vst.msk [vmem:[%s907_s25 + $0x20] sm:$0xff] %vm529_vm3, %v418_v32  ;;  %v482_v33 = vpop.f32.mrb[5].mxu1  ;;  %v727_v34 = vpop.f32.mrb[6].mxu0 }
  0xf1   : > { %550 = vst.msk [vmem:[%s907_s25 + $0xa0] sm:$0xff] %vm529_vm3, %v482_v33  ;;  %537 = vst.msk [vmem:[%s907_s25 + $0x38] sm:$0xff] %vm529_vm3, %v727_v34  ;;  %v743_v35 = vpop.f32.mrb[6].mxu1  ;;  %v421_v36 = vpop.f32.mrb[7].mxu0 }
  0xf2   : > { %553 = vst.msk [vmem:[%s907_s25 + $0xb8] sm:$0xff] %vm529_vm3, %v743_v35  ;;  %535 = vst.msk [vmem:[%s907_s25 + $0x28] sm:$0xff] %vm529_vm3, %v421_v36  ;;  %v485_v37 = vpop.f32.mrb[7].mxu1 }
  0xf3   : > { %551 = vst.msk [vmem:[%s907_s25 + $0xa8] sm:$0xff] %vm529_vm3, %v485_v37 }
  0xf6   : > { %v730_v38 = vpop.f32.mrb[8].mxu0 }
  0xf7   : > { %540 = vst.msk [vmem:[%s907_s25 + $0x50] sm:$0xff] %vm529_vm3, %v730_v38  ;;  %v746_v39 = vpop.f32.mrb[8].mxu1  ;;  %v434_v40 = vpop.f32.mrb[9].mxu0 }
  0xf8   : > { %556 = vst.msk [vmem:[%s907_s25 + $0xd0] sm:$0xff] %vm529_vm3, %v746_v39  ;;  %538 = vst.msk [vmem:[%s907_s25 + $0x40] sm:$0xff] %vm529_vm3, %v434_v40  ;;  %v498_v41 = vpop.f32.mrb[9].mxu1  ;;  %v731_v42 = vpop.f32.mrb[10].mxu0 }
  0xf9   : > { %554 = vst.msk [vmem:[%s907_s25 + $0xc0] sm:$0xff] %vm529_vm3, %v498_v41  ;;  %541 = vst.msk [vmem:[%s907_s25 + $0x58] sm:$0xff] %vm529_vm3, %v731_v42  ;;  %v747_v43 = vpop.f32.mrb[10].mxu1  ;;  %v437_v44 = vpop.f32.mrb[11].mxu0 }
  0xfa   : > { %557 = vst.msk [vmem:[%s907_s25 + $0xd8] sm:$0xff] %vm529_vm3, %v747_v43  ;;  %539 = vst.msk [vmem:[%s907_s25 + $0x48] sm:$0xff] %vm529_vm3, %v437_v44  ;;  %v501_v45 = vpop.f32.mrb[11].mxu1 }
  0xfb   : > { %555 = vst.msk [vmem:[%s907_s25 + $0xc8] sm:$0xff] %vm529_vm3, %v501_v45 }
  0xfe   : > { %v734_v46 = vpop.f32.mrb[12].mxu0 }
  0xff   : > { %544 = vst.msk [vmem:[%s907_s25 + $0x70] sm:$0xff] %vm529_vm3, %v734_v46  ;;  %v750_v47 = vpop.f32.mrb[12].mxu1  ;;  %v450_v48 = vpop.f32.mrb[13].mxu0 }
 0x100   : > { %560 = vst.msk [vmem:[%s907_s25 + $0xf0] sm:$0xff] %vm529_vm3, %v750_v47  ;;  %542 = vst.msk [vmem:[%s907_s25 + $0x60] sm:$0xff] %vm529_vm3, %v450_v48  ;;  %v514_v49 = vpop.f32.mrb[13].mxu1  ;;  %v735_v50 = vpop.f32.mrb[14].mxu0 }
 0x101   : > { %558 = vst.msk [vmem:[%s907_s25 + $0xe0] sm:$0xff] %vm529_vm3, %v514_v49  ;;  %545 = vst.msk [vmem:[%s907_s25 + $0x78] sm:$0xff] %vm529_vm3, %v735_v50  ;;  %v751_v51 = vpop.f32.mrb[14].mxu1  ;;  %v453_v52 = vpop.f32.mrb[15].mxu0 }
 0x102   : > { %561 = vst.msk [vmem:[%s907_s25 + $0xf8] sm:$0xff] %vm529_vm3, %v751_v51  ;;  %543 = vst.msk [vmem:[%s907_s25 + $0x68] sm:$0xff] %vm529_vm3, %v453_v52  ;;  %v517_v53 = vpop.f32.mrb[15].mxu1 }
 0x103   : > { %559 = vst.msk [vmem:[%s907_s25 + $0xe8] sm:$0xff] %vm529_vm3, %v517_v53 }
 0x104 PF: > { %s12_s11 = sadd.s32 1, %s821_s11   ;;  %s985_s9 = smov %s817_s10 }
 0x105   : > { %p9_p5 = scmp.ge.s32.totalorder %s12_s11, 4   ;;  %s986_s10 = smov %s988_s12 }
 0x107   :  { %11 = sbr.rel (!%p9_p5) target bundleno = 2 (0x2), region = 61 }

// kernel: feature_extraction.5
= control target key start
LH: loop header
LB: loop body
LE: loop exit
PB: predicated region body
PF: predicated region fallthrough
CT: control target
= control target key end

     0   :  { %s1551_s9 = smov 0   ;;  %s1553_s10 = smov 0   ;;  %s1798_s0 = inlined_call_operand.vmem [shape: bf16[512,288], index: 0, kind: input, shape index: {}]   ;;  %s1799_s1 = inlined_call_operand.vmem [shape: bf16[288,32], index: 1, kind: input, shape index: {}]   ;;  %s1800_s2 = inlined_call_operand.vmem [shape: f32[512,32], index: 2, kind: output, shape index: {}]  }
   0x1   :  { %s1555_s11 = smov 0  }
   0x2 LB: > { %s24_s12 = sadd.s32 1, %s1530_s10  ;;  %p1134_p0 = scmp.ge.s32.totalorder %s1534_s11, 1  ;;  %s1534_s11 = sphi %s1555_s11, %s12_s11   ;;  %s1530_s10 = sphi %s1553_s10, %s1802_s10   ;;  %s1526_s9 = sphi %s1551_s9, %s1801_s9  }
   0x3   : > { %p26_p1 = scmp.ge.s32.totalorder %s24_s12, 2  ;;  %p137_p2 = scmp.lt.s32.totalorder %s1534_s11, 3 }
   0x5   : > { %s1804_s12 = smov (%p26_p1, %s24_s12), 0  ;;  %p138_p3 = pnand %p1134_p0, %p137_p2 }
   0x6   : > { %v1430_v0 = vld [vmem:[%s1799_s1 + $0x40] sm:$0xff] (!%p138_p3)   ;;  %s1135_s15 = sshll.u32 (!%p138_p3), %s1526_s9, 5  ;;  %v1432_v2 = vld [vmem:[%s1799_s1 + $0x48] sm:$0xff] (!%p138_p3)   ;;  %v1434_v4 = vld [vmem:[%s1799_s1 + $0x50] sm:$0xff] (!%p138_p3)   ;;  %vm636_vm0 = vcmask (!%p138_p3), 261120  }
   0x7   : > { %141 = sbr.rel (%p138_p3) target bundleno = 347 (0x15b), region = 28  ;;  %v1431_v1 = vld [vmem:[%s1799_s1] sm:$0xff] (!%p138_p3)   ;;  %1223 = vmatprep.subr.bf16.mxu0 (!%p138_p3), %v1430_v0  ;;  %1389 = vmatprep.subr.bf16.mxu1 (!%p138_p3), %v1430_v0  ;;  %p168_p4 = scmp.lt.s32.totalorder (!%p138_p3), %s1135_s15, 63  ;;  %v1433_v3 = vld [vmem:[%s1799_s1 + $0x8] sm:$0xff] (!%p138_p3)   ;;  %v1435_v5 = vld [vmem:[%s1799_s1 + $0x10] sm:$0xff] (!%p138_p3)  }
   0x8   : > { %1224 = vmatpush3.bf16.msra.mxu0 (!%p138_p3), %v1431_v1  ;;  %1397 = vmatpush3.bf16.msra.mxu1 (!%p138_p3), %v1431_v1  ;;  %v1436_v6 = vld [vmem:[%s1799_s1 + $0x58] sm:$0xff] (!%p138_p3)   ;;  %v1438_v8 = vld [vmem:[%s1799_s1 + $0x60] sm:$0xff] (!%p138_p3)   ;;  %v1440_v10 = vld [vmem:[%s1799_s1 + $0x68] sm:$0xff] (!%p138_p3)  }
   0x9   : > { %1225 = vmatprep.subr.bf16.mxu0 (!%p138_p3), %v1432_v2  ;;  %1390 = vmatprep.subr.bf16.mxu1 (!%p138_p3), %v1432_v2  ;;  %v1437_v7 = vld [vmem:[%s1799_s1 + $0x18] sm:$0xff] (!%p138_p3)   ;;  %v1439_v9 = vld [vmem:[%s1799_s1 + $0x20] sm:$0xff] (!%p138_p3)   ;;  %v1441_v13 = vld [vmem:[%s1799_s1 + $0x28] sm:$0xff] (!%p138_p3)  }
   0xa   : > { %v1442_v14 = vld [vmem:[%s1799_s1 + $0x70] sm:$0xff] (!%p138_p3)   ;;  %v1444_v16 = vld [vmem:[%s1799_s1 + $0x78] sm:$0xff] (!%p138_p3)   ;;  %v1452_v18 = vld [vmem:[%s1799_s1 + $0x80] sm:$0xff] (!%p138_p3)  }
   0xb   : > { %v1443_v15 = vld [vmem:[%s1799_s1 + $0x30] sm:$0xff] (!%p138_p3)   ;;  %v1445_v17 = vld [vmem:[%s1799_s1 + $0x38] sm:$0xff] (!%p138_p3)   ;;  %v1465_v23 = vld [vmem:[%s1799_s1 + $0x88] sm:$0xff] (!%p138_p3)  }
   0xc   : > { %1226 = vmatpush3.bf16.msra.mxu0 (!%p138_p3), %v1433_v3  ;;  %1398 = vmatpush3.bf16.msra.mxu1 (!%p138_p3), %v1433_v3 }
   0xd   : > { %1227 = vmatprep.subr.bf16.mxu0 (!%p138_p3), %v1434_v4  ;;  %1391 = vmatprep.subr.bf16.mxu1 (!%p138_p3), %v1434_v4 }
   0xe   : > { %s1806_s15 = smov (!%p168_p4, %s1135_s15), 63 }
   0xf   : > { %s1405_s28 = smul.u32 12, %s1806_s15  ;;  %s1138_s30 = sshll.u32 %s1806_s15, 3 }
  0x10   : > { %1228 = vmatpush3.bf16.msra.mxu0 %v1435_v5  ;;  %1399 = vmatpush3.bf16.msra.mxu1 %v1435_v5  ;;  %s1715_s5 = scalar_lea.vmem %s1800_s2, %s1138_s30 }
  0x11   : > { %1229 = vmatprep.subr.bf16.mxu0 %v1436_v6  ;;  %1392 = vmatprep.subr.bf16.mxu1 %v1436_v6  ;;  %s1602_s7 = scalar_lea.vmem %s1798_s0, %s1405_s28 }
  0x12   : > { %v1448_v11 = vld [vmem:[%s1602_s7 + $0x4] ss:$12 sps:$4 sm:$0xff]   ;;  %v1446_v19 = vld [vmem:[%s1602_s7] ss:$12 sps:$4 sm:$0xff]   ;;  %v1453_v21 = vld [vmem:[%s1602_s7 + $0x1c] ss:$12 sps:$4 sm:$0xff]  }
  0x13   : > { %v1451_v12 = vld [vmem:[%s1602_s7 + $0x124] ss:$12 sps:$4 sm:$0xff]   ;;  %717 = vmatprep.mubr.bf16.mxu0 %v1448_v11  ;;  %v1449_v20 = vld [vmem:[%s1602_s7 + $0x120] ss:$12 sps:$4 sm:$0xff]   ;;  %v1455_v22 = vld [vmem:[%s1602_s7 + $0x13c] ss:$12 sps:$4 sm:$0xff]  }
  0x14   : > { %1230 = vmatpush3.bf16.msra.mxu0 %v1437_v7  ;;  %1400 = vmatpush3.bf16.msra.mxu1 %v1437_v7  ;;  %v1457_v24 = vld [vmem:[%s1602_s7 + $0x18] ss:$12 sps:$4 sm:$0xff]   ;;  %v1459_v26 = vld [vmem:[%s1602_s7 + $0x34] ss:$12 sps:$4 sm:$0xff]   ;;  %v1463_v28 = vld [vmem:[%s1602_s7 + $0x30] ss:$12 sps:$4 sm:$0xff]  }
  0x15   : > { %1231 = vmatprep.subr.bf16.mxu0 %v1438_v8  ;;  %1393 = vmatprep.subr.bf16.mxu1 %v1438_v8  ;;  %v1458_v25 = vld [vmem:[%s1602_s7 + $0x138] ss:$12 sps:$4 sm:$0xff]   ;;  %v1461_v27 = vld [vmem:[%s1602_s7 + $0x154] ss:$12 sps:$4 sm:$0xff]   ;;  %v1464_v29 = vld [vmem:[%s1602_s7 + $0x150] ss:$12 sps:$4 sm:$0xff]  }
  0x16   : > { %813 = vmatprep.mubr.bf16.mxu1 %v1451_v12  ;;  %v1466_v30 = vld [vmem:[%s1602_s7 + $0x4c] ss:$12 sps:$4 sm:$0xff]   ;;  %v1470_v32 = vld [vmem:[%s1602_s7 + $0x48] ss:$12 sps:$4 sm:$0xff]   ;;  %v1472_v34 = vld [vmem:[%s1602_s7 + $0x64] ss:$12 sps:$4 sm:$0xff]  }
  0x17   : > { %v1468_v31 = vld [vmem:[%s1602_s7 + $0x16c] ss:$12 sps:$4 sm:$0xff]   ;;  %v1471_v33 = vld [vmem:[%s1602_s7 + $0x168] ss:$12 sps:$4 sm:$0xff]   ;;  %v1481_v41 = vld [vmem:[%s1602_s7 + $0x50] ss:$12 sps:$4 sm:$0xff]  }
  0x18   : > { %1232 = vmatpush3.bf16.msra.mxu0 %v1439_v9  ;;  %1401 = vmatpush3.bf16.msra.mxu1 %v1439_v9  ;;  %v1474_v35 = vld [vmem:[%s1602_s7 + $0x8] ss:$12 sps:$4 sm:$0xff]   ;;  %v1475_v36 = vld [vmem:[%s1602_s7 + $0x60] ss:$12 sps:$4 sm:$0xff]   ;;  %v1479_v39 = vld [vmem:[%s1602_s7 + $0x38] ss:$12 sps:$4 sm:$0xff]  }
  0x19   : > { %1233 = vmatprep.subr.bf16.mxu0 %v1440_v10  ;;  %1394 = vmatprep.subr.bf16.mxu1 %v1440_v10  ;;  %v1476_v37 = vld [vmem:[%s1602_s7 + $0x20] ss:$12 sps:$4 sm:$0xff]   ;;  %v1477_v38 = vld [vmem:[%s1602_s7 + $0x7c] ss:$12 sps:$4 sm:$0xff]   ;;  %v1480_v40 = vld [vmem:[%s1602_s7 + $0x78] ss:$12 sps:$4 sm:$0xff]  }
  0x1a   : > { %v1482_v42 = vld [vmem:[%s1602_s7 + $0x94] ss:$12 sps:$4 sm:$0xff]   ;;  %v1485_v44 = vld [vmem:[%s1602_s7 + $0x90] ss:$12 sps:$4 sm:$0xff]   ;;  %v1487_v46 = vld [vmem:[%s1602_s7 + $0xac] ss:$12 sps:$4 sm:$0xff]  }
  0x1b   : > { %v1484_v43 = vld [vmem:[%s1602_s7 + $0x68] ss:$12 sps:$4 sm:$0xff]   ;;  %v1486_v45 = vld [vmem:[%s1602_s7 + $0x80] ss:$12 sps:$4 sm:$0xff]   ;;  %v1489_v47 = vld [vmem:[%s1602_s7 + $0x98] ss:$12 sps:$4 sm:$0xff]  }
  0x1c   : > { %1234 = vmatpush3.bf16.msra.mxu0 %v1441_v13  ;;  %1402 = vmatpush3.bf16.msra.mxu1 %v1441_v13  ;;  %v1490_v48 = vld [vmem:[%s1602_s7 + $0xa8] ss:$12 sps:$4 sm:$0xff]   ;;  %v1491_v49 = vld [vmem:[%s1602_s7 + $0xb0] ss:$12 sps:$4 sm:$0xff]   ;;  %v1495_v52 = vld [vmem:[%s1602_s7 + $0xc0] ss:$12 sps:$4 sm:$0xff]  }
  0x1d   : > { %1235 = vmatprep.subr.bf16.mxu0 %v1442_v14  ;;  %1395 = vmatprep.subr.bf16.mxu1 %v1442_v14  ;;  %v1492_v50 = vld [vmem:[%s1602_s7 + $0xc4] ss:$12 sps:$4 sm:$0xff]   ;;  %v1494_v51 = vld [vmem:[%s1602_s7 + $0xc8] ss:$12 sps:$4 sm:$0xff]   ;;  %v1496_v53 = vld [vmem:[%s1602_s7 + $0xe0] ss:$12 sps:$4 sm:$0xff]  }
  0x1e   : > { %v1497_v54 = vld [vmem:[%s1602_s7 + $0xdc] ss:$12 sps:$4 sm:$0xff]   ;;  %v1499_v55 = vld [vmem:[%s1602_s7 + $0xf8] ss:$12 sps:$4 sm:$0xff]   ;;  %v1502_v58 = vld [vmem:[%s1602_s7 + $0xf4] ss:$12 sps:$4 sm:$0xff]  }
  0x1f   : > { %v1500_v56 = vld [vmem:[%s1602_s7 + $0xd8] ss:$12 sps:$4 sm:$0xff]   ;;  %v1501_v57 = vld [vmem:[%s1602_s7 + $0x110] ss:$12 sps:$4 sm:$0xff]   ;;  %v1504_v59 = vld [vmem:[%s1602_s7 + $0x128] ss:$12 sps:$4 sm:$0xff]  }
  0x20   : > { %1236 = vmatpush3.bf16.msra.mxu0 %v1443_v15  ;;  %1403 = vmatpush3.bf16.msra.mxu1 %v1443_v15  ;;  %v1505_v60 = vld [vmem:[%s1602_s7 + $0xf0] ss:$12 sps:$4 sm:$0xff]   ;;  %v1506_v61 = vld [vmem:[%s1602_s7 + $0x140] ss:$12 sps:$4 sm:$0xff]   ;;  %v1509_v63 = vld [vmem:[%s1602_s7 + $0x158] ss:$12 sps:$4 sm:$0xff]  }
  0x21   : > { %1237 = vmatprep.subr.bf16.mxu0 %v1444_v16  ;;  %1396 = vmatprep.subr.bf16.mxu1 %v1444_v16  ;;  %v1507_v62 = vld [vmem:[%s1602_s7 + $0x10c] ss:$12 sps:$4 sm:$0xff]   ;;  %v1510_v0 = vld [vmem:[%s1602_s7 + $0x108] ss:$12 sps:$4 sm:$0xff]   ;;  %v1511_v1 = vld [vmem:[%s1602_s7 + $0x170] ss:$12 sps:$4 sm:$0xff]  }
  0x24   : > { %1238 = vmatpush3.bf16.msra.mxu0 %v1445_v17  ;;  %1404 = vmatpush3.bf16.msra.mxu1 %v1445_v17 }
  0x25   : > { %1353 = vmatprep.subr.bf16.mxu1 %v1452_v18 }
  0x27   : > { %718 = vmatmul.mubr.bf16.vlgmr.msra.gmra.mrb[0].mxu0 %v1446_v19  ;;  %814 = vmatmul.mubr.bf16.vlgmr.msra.gmra.mrb[0].mxu1 %v1449_v20 }
  0x28   : > { %1354 = vmatpush3.bf16.msra.mxu1 %v1452_v18  ;;  %725 = vmatprep.mubr.bf16.mxu0 %v1453_v21 }
  0x29   : > { %821 = vmatprep.mubr.bf16.mxu1 %v1455_v22  ;;  %1355 = vmatprep.subr.bf16.mxu1 %v1465_v23 }
  0x2c   : > { %1356 = vmatpush3.bf16.msra.mxu1 %v1465_v23 }
  0x2f   : > { %726 = vmatmul.mubr.bf16.gmra.mrb[4].mxu0 %v1457_v24  ;;  %822 = vmatmul.mubr.bf16.gmra.mrb[4].mxu1 %v1458_v25 }
  0x30   : > { %733 = vmatprep.mubr.bf16.mxu0 %v1459_v26  ;;  %829 = vmatprep.mubr.bf16.mxu1 %v1461_v27 }
  0x37   : > { %734 = vmatmul.mubr.bf16.gmra.mrb[8].mxu0 %v1463_v28  ;;  %830 = vmatmul.mubr.bf16.gmra.mrb[8].mxu1 %v1464_v29 }
  0x38   : > { %741 = vmatprep.mubr.bf16.mxu0 %v1466_v30  ;;  %837 = vmatprep.mubr.bf16.mxu1 %v1468_v31 }
  0x3f   : > { %742 = vmatmul.mubr.bf16.gmra.mrb[12].mxu0 %v1470_v32  ;;  %838 = vmatmul.mubr.bf16.gmra.mrb[12].mxu1 %v1471_v33 }
  0x40   : > { %749 = vmatprep.mubr.bf16.mxu0 %v1472_v34  ;;  %1357 = vmatprep.mubr.msk.bf16.mxu1 %vm636_vm0, %v1474_v35 }
  0x47   : > { %750 = vmatmul.mubr.bf16.gmra.mrb[16].mxu0 %v1475_v36  ;;  %1358 = vmatmul.mubr.msk.bf16.vlgmr.msra.gmra.mrb[16].mxu1 %vm636_vm0, %v1476_v37 }
  0x48   : > { %757 = vmatprep.mubr.bf16.mxu0 %v1477_v38  ;;  %1361 = vmatprep.mubr.msk.bf16.mxu1 %vm636_vm0, %v1479_v39 }
  0x4f   : > { %758 = vmatmul.mubr.bf16.gmra.mrb[20].mxu0 %v1480_v40  ;;  %1362 = vmatmul.mubr.msk.bf16.gmra.mrb[20].mxu1 %vm636_vm0, %v1481_v41 }
  0x50   : > { %765 = vmatprep.mubr.bf16.mxu0 %v1482_v42  ;;  %1365 = vmatprep.mubr.msk.bf16.mxu1 %vm636_vm0, %v1484_v43 }
  0x57   : > { %766 = vmatmul.mubr.bf16.gmra.mrb[24].mxu0 %v1485_v44  ;;  %1366 = vmatmul.mubr.msk.bf16.gmra.mrb[24].mxu1 %vm636_vm0, %v1486_v45 }
  0x58   : > { %773 = vmatprep.mubr.bf16.mxu0 %v1487_v46  ;;  %1369 = vmatprep.mubr.msk.bf16.mxu1 %vm636_vm0, %v1489_v47 }
  0x5f   : > { %774 = vmatmul.mubr.bf16.gmra.mrb[28].mxu0 %v1490_v48  ;;  %1370 = vmatmul.mubr.msk.bf16.gmra.mrb[28].mxu1 %vm636_vm0, %v1491_v49 }
  0x60   : > { %781 = vmatprep.mubr.bf16.mxu0 %v1492_v50  ;;  %1373 = vmatprep.mubr.msk.bf16.mxu1 %vm636_vm0, %v1494_v51 }
  0x67   : > { %782 = vmatmul.mubr.bf16.gmra.mrb[32].mxu0 %v1495_v52  ;;  %1374 = vmatmul.mubr.msk.bf16.gmra.mrb[32].mxu1 %vm636_vm0, %v1496_v53 }
  0x68   : > { %789 = vmatprep.mubr.bf16.mxu0 %v1497_v54  ;;  %1377 = vmatprep.mubr.msk.bf16.mxu1 %vm636_vm0, %v1499_v55 }
  0x6f   : > { %790 = vmatmul.mubr.bf16.gmra.mrb[36].mxu0 %v1500_v56  ;;  %1378 = vmatmul.mubr.msk.bf16.gmra.mrb[36].mxu1 %vm636_vm0, %v1501_v57 }
  0x70   : > { %797 = vmatprep.mubr.bf16.mxu0 %v1502_v58  ;;  %1381 = vmatprep.mubr.msk.bf16.mxu1 %vm636_vm0, %v1504_v59 }
  0x77   : > { %798 = vmatmul.mubr.bf16.gmra.mrb[40].mxu0 %v1505_v60  ;;  %1382 = vmatmul.mubr.msk.bf16.gmra.mrb[40].mxu1 %vm636_vm0, %v1506_v61 }
  0x78   : > { %805 = vmatprep.mubr.bf16.mxu0 %v1507_v62  ;;  %1385 = vmatprep.mubr.msk.bf16.mxu1 %vm636_vm0, %v1509_v63 }
  0x7f   : > { %806 = vmatmul.mubr.bf16.gmra.mrb[44].mxu0 %v1510_v0  ;;  %1386 = vmatmul.mubr.msk.bf16.gmra.mrb[44].mxu1 %vm636_vm0, %v1511_v1 }
  0xfa   : > { %v1239_v2 = vpop.f32.mrb[0].mxu0  ;;  %v1311_v3 = vpop.f32.mrb[0].mxu1 }
  0xfb   : > { %v1240_v4 = vpop.f32.mrb[1].mxu0  ;;  %v1312_v5 = vpop.f32.mrb[1].mxu1 }
  0xfc   : > { %v1241_v6 = vadd.f32 %v1240_v4, %v1239_v2  ;;  %v1695_v7 = vadd.f32 %v1312_v5, %v1311_v3  ;;  %v1242_v8 = vpop.f32.mrb[2].mxu0  ;;  %v1314_v9 = vpop.f32.mrb[2].mxu1 }
  0xfd   : > { %v1243_v10 = vpop.f32.mrb[3].mxu0  ;;  %v1315_v11 = vpop.f32.mrb[3].mxu1 }
  0xfe   : > { %v1244_v12 = vadd.f32 %v1243_v10, %v1242_v8  ;;  %v1697_v13 = vadd.f32 %v1315_v11, %v1314_v9 }
 0x102   : > { %v1245_v14 = vpop.f32.mrb[4].mxu0  ;;  %v1317_v15 = vpop.f32.mrb[4].mxu1 }
 0x103   : > { %v1246_v16 = vpop.f32.mrb[5].mxu0  ;;  %v1318_v17 = vpop.f32.mrb[5].mxu1 }
 0x104   : > { %v1247_v18 = vadd.f32 %v1246_v16, %v1245_v14  ;;  %v1699_v19 = vadd.f32 %v1318_v17, %v1317_v15  ;;  %v1248_v20 = vpop.f32.mrb[6].mxu0  ;;  %v1320_v21 = vpop.f32.mrb[6].mxu1 }
 0x105   : > { %v1249_v22 = vpop.f32.mrb[7].mxu0  ;;  %v1321_v23 = vpop.f32.mrb[7].mxu1 }
 0x106   : > { %v1250_v24 = vadd.f32 %v1249_v22, %v1248_v20  ;;  %v1701_v25 = vadd.f32 %v1321_v23, %v1320_v21 }
 0x10a   : > { %v1251_v26 = vpop.f32.mrb[8].mxu0  ;;  %v1323_v27 = vpop.f32.mrb[8].mxu1 }
 0x10b   : > { %v1252_v28 = vpop.f32.mrb[9].mxu0  ;;  %v1324_v29 = vpop.f32.mrb[9].mxu1 }
 0x10c   : > { %v1253_v30 = vadd.f32 %v1252_v28, %v1251_v26  ;;  %v1703_v31 = vadd.f32 %v1324_v29, %v1323_v27  ;;  %v1254_v32 = vpop.f32.mrb[10].mxu0  ;;  %v1326_v33 = vpop.f32.mrb[10].mxu1 }
 0x10d   : > { %v1255_v34 = vpop.f32.mrb[11].mxu0  ;;  %v1327_v35 = vpop.f32.mrb[11].mxu1 }
 0x10e   : > { %v1256_v36 = vadd.f32 %v1255_v34, %v1254_v32  ;;  %v1705_v37 = vadd.f32 %v1327_v35, %v1326_v33 }
 0x112   : > { %v1257_v38 = vpop.f32.mrb[12].mxu0  ;;  %v1329_v39 = vpop.f32.mrb[12].mxu1 }
 0x113   : > { %v1258_v40 = vpop.f32.mrb[13].mxu0  ;;  %v1330_v41 = vpop.f32.mrb[13].mxu1 }
 0x114   : > { %v1259_v42 = vadd.f32 %v1258_v40, %v1257_v38  ;;  %v1707_v43 = vadd.f32 %v1330_v41, %v1329_v39  ;;  %v1260_v44 = vpop.f32.mrb[14].mxu0  ;;  %v1332_v45 = vpop.f32.mrb[14].mxu1 }
 0x115   : > { %v1261_v46 = vpop.f32.mrb[15].mxu0  ;;  %v1333_v47 = vpop.f32.mrb[15].mxu1 }
 0x116   : > { %v1262_v48 = vadd.f32 %v1261_v46, %v1260_v44  ;;  %v1709_v49 = vadd.f32 %v1333_v47, %v1332_v45 }
 0x11a   : > { %v1263_v50 = vpop.f32.mrb[16].mxu0  ;;  %v1359_v51 = vpop.f32.mrb[16].mxu1 }
 0x11b   : > { %v889_v52 = vadd.f32 %v1359_v51, %v1247_v18  ;;  %v1264_v53 = vpop.f32.mrb[17].mxu0  ;;  %v880_v54 = vpop.f32.mrb[17].mxu1 }
 0x11c   : > { %v1265_v55 = vadd.f32 %v1264_v53, %v1263_v50  ;;  %v881_v56 = vadd.f32 %v1241_v6, %v880_v54  ;;  %v1266_v57 = vpop.f32.mrb[18].mxu0  ;;  %v1360_v58 = vpop.f32.mrb[18].mxu1 }
 0x11d   : > { %1009 = vst.msk [vmem:[%s1715_s5 + $0x10] sm:$0xff] %vm636_vm0, %v889_v52  ;;  %v892_v59 = vadd.f32 %v1360_v58, %v1250_v24  ;;  %v1267_v60 = vpop.f32.mrb[19].mxu0  ;;  %v883_v61 = vpop.f32.mrb[19].mxu1 }
 0x11e   : > { %1007 = vst.msk [vmem:[%s1715_s5] sm:$0xff] %vm636_vm0, %v881_v56  ;;  %v1268_v62 = vadd.f32 %v1267_v60, %v1266_v57  ;;  %v884_v63 = vadd.f32 %v1244_v12, %v883_v61 }
 0x11f   : > { %1010 = vst.msk [vmem:[%s1715_s5 + $0x18] sm:$0xff] %vm636_vm0, %v892_v59 }
 0x120   : > { %1008 = vst.msk [vmem:[%s1715_s5 + $0x8] sm:$0xff] %vm636_vm0, %v884_v63 }
 0x122   : > { %v1269_v0 = vpop.f32.mrb[20].mxu0  ;;  %v1363_v1 = vpop.f32.mrb[20].mxu1 }
 0x123   : > { %v905_v2 = vadd.f32 %v1363_v1, %v1259_v42  ;;  %v1270_v3 = vpop.f32.mrb[21].mxu0  ;;  %v896_v4 = vpop.f32.mrb[21].mxu1 }
 0x124   : > { %v1271_v5 = vadd.f32 %v1270_v3, %v1269_v0  ;;  %v897_v6 = vadd.f32 %v1253_v30, %v896_v4  ;;  %v1272_v8 = vpop.f32.mrb[22].mxu0  ;;  %v1364_v9 = vpop.f32.mrb[22].mxu1 }
 0x125   : > { %1013 = vst.msk [vmem:[%s1715_s5 + $0x30] sm:$0xff] %vm636_vm0, %v905_v2  ;;  %v908_v10 = vadd.f32 %v1364_v9, %v1262_v48  ;;  %v1273_v11 = vpop.f32.mrb[23].mxu0  ;;  %v899_v12 = vpop.f32.mrb[23].mxu1 }
 0x126   : > { %1011 = vst.msk [vmem:[%s1715_s5 + $0x20] sm:$0xff] %vm636_vm0, %v897_v6  ;;  %v1274_v14 = vadd.f32 %v1273_v11, %v1272_v8  ;;  %v900_v15 = vadd.f32 %v1256_v36, %v899_v12 }
 0x127   : > { %1014 = vst.msk [vmem:[%s1715_s5 + $0x38] sm:$0xff] %vm636_vm0, %v908_v10 }
 0x128   : > { %1012 = vst.msk [vmem:[%s1715_s5 + $0x28] sm:$0xff] %vm636_vm0, %v900_v15 }
 0x12a   : > { %v1275_v16 = vpop.f32.mrb[24].mxu0  ;;  %v1367_v17 = vpop.f32.mrb[24].mxu1 }
 0x12b   : > { %v921_v18 = vadd.f32 %v1367_v17, %v1271_v5  ;;  %v1276_v20 = vpop.f32.mrb[25].mxu0  ;;  %v912_v21 = vpop.f32.mrb[25].mxu1 }
 0x12c   : > { %v1277_v22 = vadd.f32 %v1276_v20, %v1275_v16  ;;  %v913_v23 = vadd.f32 %v1265_v55, %v912_v21  ;;  %v1278_v24 = vpop.f32.mrb[26].mxu0  ;;  %v1368_v26 = vpop.f32.mrb[26].mxu1 }
 0x12d   : > { %1017 = vst.msk [vmem:[%s1715_s5 + $0x50] sm:$0xff] %vm636_vm0, %v921_v18  ;;  %v924_v27 = vadd.f32 %v1368_v26, %v1274_v14  ;;  %v1279_v28 = vpop.f32.mrb[27].mxu0  ;;  %v915_v29 = vpop.f32.mrb[27].mxu1 }
 0x12e   : > { %1015 = vst.msk [vmem:[%s1715_s5 + $0x40] sm:$0xff] %vm636_vm0, %v913_v23  ;;  %v1280_v30 = vadd.f32 %v1279_v28, %v1278_v24  ;;  %v916_v32 = vadd.f32 %v1268_v62, %v915_v29 }
 0x12f   : > { %1018 = vst.msk [vmem:[%s1715_s5 + $0x58] sm:$0xff] %vm636_vm0, %v924_v27 }
 0x130   : > { %1016 = vst.msk [vmem:[%s1715_s5 + $0x48] sm:$0xff] %vm636_vm0, %v916_v32 }
 0x132   : > { %v1281_v33 = vpop.f32.mrb[28].mxu0  ;;  %v1371_v34 = vpop.f32.mrb[28].mxu1 }
 0x133   : > { %v1282_v35 = vpop.f32.mrb[29].mxu0  ;;  %v928_v36 = vpop.f32.mrb[29].mxu1 }
 0x134   : > { %v1283_v38 = vadd.f32 %v1282_v35, %v1281_v33  ;;  %v929_v39 = vadd.f32 %v1277_v22, %v928_v36  ;;  %v1284_v40 = vpop.f32.mrb[30].mxu0  ;;  %v1372_v41 = vpop.f32.mrb[30].mxu1 }
 0x135   : > { %v1285_v42 = vpop.f32.mrb[31].mxu0  ;;  %v931_v44 = vpop.f32.mrb[31].mxu1 }
 0x136   : > { %v937_v45 = vadd.f32 %v1371_v34, %v1283_v38  ;;  %1019 = vst.msk [vmem:[%s1715_s5 + $0x60] sm:$0xff] %vm636_vm0, %v929_v39  ;;  %v1286_v46 = vadd.f32 %v1285_v42, %v1284_v40  ;;  %v932_v47 = vadd.f32 %v1280_v30, %v931_v44 }
 0x138   : > { %1021 = vst.msk [vmem:[%s1715_s5 + $0x70] sm:$0xff] %vm636_vm0, %v937_v45  ;;  %v940_v48 = vadd.f32 %v1372_v41, %v1286_v46  ;;  %1020 = vst.msk [vmem:[%s1715_s5 + $0x68] sm:$0xff] %vm636_vm0, %v932_v47 }
 0x13a   : > { %1022 = vst.msk [vmem:[%s1715_s5 + $0x78] sm:$0xff] %vm636_vm0, %v940_v48  ;;  %v1287_v50 = vpop.f32.mrb[32].mxu0  ;;  %v1375_v51 = vpop.f32.mrb[32].mxu1 }
 0x13b   : > { %v1288_v52 = vpop.f32.mrb[33].mxu0  ;;  %v944_v53 = vpop.f32.mrb[33].mxu1 }
 0x13c   : > { %v1289_v54 = vadd.f32 %v1288_v52, %v1287_v50  ;;  %v1290_v55 = vpop.f32.mrb[34].mxu0  ;;  %v1376_v56 = vpop.f32.mrb[34].mxu1 }
 0x13d   : > { %v1291_v57 = vpop.f32.mrb[35].mxu0  ;;  %v947_v58 = vpop.f32.mrb[35].mxu1 }
 0x13e   : > { %v945_v59 = vadd.f32 %v1289_v54, %v944_v53  ;;  %v1292_v60 = vadd.f32 %v1291_v57, %v1290_v55 }
 0x140   : > { %1023 = vst.msk [vmem:[%s1715_s5 + $0x80] sm:$0xff] %vm636_vm0, %v945_v59  ;;  %v948_v61 = vadd.f32 %v1292_v60, %v947_v58 }
 0x142   : > { %1024 = vst.msk [vmem:[%s1715_s5 + $0x88] sm:$0xff] %vm636_vm0, %v948_v61  ;;  %v1293_v62 = vpop.f32.mrb[36].mxu0  ;;  %v1379_v63 = vpop.f32.mrb[36].mxu1 }
 0x143   : > { %v1294_v0 = vpop.f32.mrb[37].mxu0  ;;  %v960_v1 = vpop.f32.mrb[37].mxu1 }
 0x144   : > { %v1295_v2 = vadd.f32 %v1294_v0, %v1293_v62  ;;  %v1296_v3 = vpop.f32.mrb[38].mxu0  ;;  %v1380_v4 = vpop.f32.mrb[38].mxu1 }
 0x145   : > { %v1297_v5 = vpop.f32.mrb[39].mxu0  ;;  %v963_v6 = vpop.f32.mrb[39].mxu1 }
 0x146   : > { %v953_v8 = vadd.f32 %v1375_v51, %v1295_v2  ;;  %v1298_v9 = vadd.f32 %v1297_v5, %v1296_v3 }
 0x148   : > { %1025 = vst.msk [vmem:[%s1715_s5 + $0x90] sm:$0xff] %vm636_vm0, %v953_v8  ;;  %v956_v10 = vadd.f32 %v1376_v56, %v1298_v9 }
 0x14a   : > { %1026 = vst.msk [vmem:[%s1715_s5 + $0x98] sm:$0xff] %vm636_vm0, %v956_v10  ;;  %v1299_v11 = vpop.f32.mrb[40].mxu0  ;;  %v1383_v12 = vpop.f32.mrb[40].mxu1 }
 0x14b   : > { %v985_v14 = vadd.f32 %v1383_v12, %v1699_v19  ;;  %v1300_v15 = vpop.f32.mrb[41].mxu0  ;;  %v976_v16 = vpop.f32.mrb[41].mxu1 }
 0x14c   : > { %v1301_v17 = vadd.f32 %v1300_v15, %v1299_v11  ;;  %v977_v18 = vadd.f32 %v1695_v7, %v976_v16  ;;  %v1302_v20 = vpop.f32.mrb[42].mxu0  ;;  %v1384_v21 = vpop.f32.mrb[42].mxu1 }
 0x14d   : > { %1033 = vst.msk [vmem:[%s1715_s5 + $0xd0] sm:$0xff] %vm636_vm0, %v985_v14  ;;  %v988_v22 = vadd.f32 %v1384_v21, %v1701_v25  ;;  %v1303_v23 = vpop.f32.mrb[43].mxu0  ;;  %v979_v24 = vpop.f32.mrb[43].mxu1 }
 0x14e   : > { %v961_v26 = vadd.f32 %v1301_v17, %v960_v1  ;;  %1031 = vst.msk [vmem:[%s1715_s5 + $0xc0] sm:$0xff] %vm636_vm0, %v977_v18  ;;  %v1304_v19 = vadd.f32 %v1303_v23, %v1302_v20  ;;  %v980_v27 = vadd.f32 %v1697_v13, %v979_v24 }
 0x14f   : > { %1034 = vst.msk [vmem:[%s1715_s5 + $0xd8] sm:$0xff] %vm636_vm0, %v988_v22 }
 0x150   : > { %1027 = vst.msk [vmem:[%s1715_s5 + $0xa0] sm:$0xff] %vm636_vm0, %v961_v26  ;;  %v964_v7 = vadd.f32 %v1304_v19, %v963_v6  ;;  %1032 = vst.msk [vmem:[%s1715_s5 + $0xc8] sm:$0xff] %vm636_vm0, %v980_v27 }
 0x152   : > { %1028 = vst.msk [vmem:[%s1715_s5 + $0xa8] sm:$0xff] %vm636_vm0, %v964_v7  ;;  %v1305_v25 = vpop.f32.mrb[44].mxu0  ;;  %v1387_v28 = vpop.f32.mrb[44].mxu1 }
 0x153   : > { %v1001_v29 = vadd.f32 %v1387_v28, %v1707_v43  ;;  %v1306_v30 = vpop.f32.mrb[45].mxu0  ;;  %v992_v32 = vpop.f32.mrb[45].mxu1 }
 0x154   : > { %v1307_v13 = vadd.f32 %v1306_v30, %v1305_v25  ;;  %v993_v33 = vadd.f32 %v1703_v31, %v992_v32  ;;  %v1308_v34 = vpop.f32.mrb[46].mxu0  ;;  %v1388_v35 = vpop.f32.mrb[46].mxu1 }
 0x155   : > { %1037 = vst.msk [vmem:[%s1715_s5 + $0xf0] sm:$0xff] %vm636_vm0, %v1001_v29  ;;  %v1004_v36 = vadd.f32 %v1388_v35, %v1709_v49  ;;  %v1309_v38 = vpop.f32.mrb[47].mxu0  ;;  %v995_v39 = vpop.f32.mrb[47].mxu1 }
 0x156   : > { %v969_v40 = vadd.f32 %v1379_v63, %v1307_v13  ;;  %1035 = vst.msk [vmem:[%s1715_s5 + $0xe0] sm:$0xff] %vm636_vm0, %v993_v33  ;;  %v1310_v43 = vadd.f32 %v1309_v38, %v1308_v34  ;;  %v996_v41 = vadd.f32 %v1705_v37, %v995_v39 }
 0x157   : > { %1038 = vst.msk [vmem:[%s1715_s5 + $0xf8] sm:$0xff] %vm636_vm0, %v1004_v36 }
 0x158   : > { %1029 = vst.msk [vmem:[%s1715_s5 + $0xb0] sm:$0xff] %vm636_vm0, %v969_v40  ;;  %v972_v42 = vadd.f32 %v1380_v4, %v1310_v43  ;;  %1036 = vst.msk [vmem:[%s1715_s5 + $0xe8] sm:$0xff] %vm636_vm0, %v996_v41 }
 0x15a   : > { %1030 = vst.msk [vmem:[%s1715_s5 + $0xb8] sm:$0xff] %vm636_vm0, %v972_v42 }
 0x15b PF: > { %s12_s11 = sadd.s32 1, %s1534_s11   ;;  %s1801_s9 = smov %s1530_s10 }
 0x15c   : > { %p9_p5 = scmp.ge.s32.totalorder %s12_s11, 4   ;;  %s1802_s10 = smov %s1804_s12 }
 0x15e   :  { %11 = sbr.rel (!%p9_p5) target bundleno = 2 (0x2), region = 61 }

// kernel: feature_extraction.6
= control target key start
LH: loop header
LB: loop body
LE: loop exit
PB: predicated region body
PF: predicated region fallthrough
CT: control target
= control target key end

     0   :  { %vm308_vm0 = vcmask 261120   ;;  %s976_s1 = inlined_call_operand.vmem [shape: bf16[288,32], index: 1, kind: input, shape index: {}]   ;;  %s977_s0 = inlined_call_operand.vmem [shape: bf16[128,288], index: 0, kind: input, shape index: {}]   ;;  %s978_s2 = inlined_call_operand.vmem [shape: f32[128,32], index: 2, kind: output, shape index: {}]  }
   0x1   :  { %v707_v0 = vld [vmem:[%s976_s1 + $0x40] sm:$0xff]   ;;  %v709_v2 = vld [vmem:[%s976_s1 + $0x48] sm:$0xff]   ;;  %v711_v4 = vld [vmem:[%s976_s1 + $0x50] sm:$0xff]  }
   0x2   :  { %v708_v1 = vld [vmem:[%s976_s1] sm:$0xff]   ;;  %597 = vmatprep.subr.bf16.mxu0 %v707_v0  ;;  %691 = vmatprep.subr.bf16.mxu1 %v707_v0  ;;  %v710_v3 = vld [vmem:[%s976_s1 + $0x8] sm:$0xff]   ;;  %v712_v5 = vld [vmem:[%s976_s1 + $0x10] sm:$0xff]  }
   0x3   :  { %598 = vmatpush3.bf16.msra.mxu0 %v708_v1  ;;  %699 = vmatpush3.bf16.msra.mxu1 %v708_v1  ;;  %v713_v6 = vld [vmem:[%s976_s1 + $0x58] sm:$0xff]   ;;  %v715_v8 = vld [vmem:[%s976_s1 + $0x60] sm:$0xff]   ;;  %v717_v10 = vld [vmem:[%s976_s1 + $0x68] sm:$0xff]  }
   0x4   :  { %599 = vmatprep.subr.bf16.mxu0 %v709_v2  ;;  %692 = vmatprep.subr.bf16.mxu1 %v709_v2  ;;  %v714_v7 = vld [vmem:[%s976_s1 + $0x18] sm:$0xff]   ;;  %v716_v9 = vld [vmem:[%s976_s1 + $0x20] sm:$0xff]   ;;  %v718_v13 = vld [vmem:[%s976_s1 + $0x28] sm:$0xff]  }
   0x5   :  { %v725_v11 = vld [vmem:[%s977_s0 + $0x4] ss:$12 sps:$4 sm:$0xff]   ;;  %v728_v12 = vld [vmem:[%s977_s0 + $0x94] ss:$12 sps:$4 sm:$0xff]   ;;  %v721_v16 = vld [vmem:[%s976_s1 + $0x78] sm:$0xff]  }
   0x6   :  { %v719_v14 = vld [vmem:[%s976_s1 + $0x70] sm:$0xff]   ;;  %365 = vmatprep.mubr.bf16.mxu0 %v725_v11  ;;  %413 = vmatprep.mubr.bf16.mxu1 %v728_v12  ;;  %v722_v17 = vld [vmem:[%s976_s1 + $0x38] sm:$0xff]   ;;  %v723_v18 = vld [vmem:[%s977_s0] ss:$12 sps:$4 sm:$0xff]  }
   0x7   :  { %600 = vmatpush3.bf16.msra.mxu0 %v710_v3  ;;  %700 = vmatpush3.bf16.msra.mxu1 %v710_v3  ;;  %v720_v15 = vld [vmem:[%s976_s1 + $0x30] sm:$0xff]   ;;  %v729_v19 = vld [vmem:[%s976_s1 + $0x80] sm:$0xff]   ;;  %v730_v21 = vld [vmem:[%s977_s0 + $0x1c] ss:$12 sps:$4 sm:$0xff]  }
   0x8   :  { %601 = vmatprep.subr.bf16.mxu0 %v711_v4  ;;  %693 = vmatprep.subr.bf16.mxu1 %v711_v4  ;;  %v726_v20 = vld [vmem:[%s977_s0 + $0x90] ss:$12 sps:$4 sm:$0xff]   ;;  %v732_v22 = vld [vmem:[%s977_s0 + $0xac] ss:$12 sps:$4 sm:$0xff]   ;;  %v735_v25 = vld [vmem:[%s977_s0 + $0xa8] ss:$12 sps:$4 sm:$0xff]  }
   0x9   :  { %v736_v23 = vld [vmem:[%s976_s1 + $0x88] sm:$0xff]   ;;  %v734_v24 = vld [vmem:[%s977_s0 + $0x18] ss:$12 sps:$4 sm:$0xff]   ;;  %v737_v26 = vld [vmem:[%s977_s0 + $0x34] ss:$12 sps:$4 sm:$0xff]  }
   0xa   :  { %v739_v27 = vld [vmem:[%s977_s0 + $0x8] ss:$12 sps:$4 sm:$0xff]   ;;  %v740_v28 = vld [vmem:[%s977_s0 + $0x30] ss:$12 sps:$4 sm:$0xff]   ;;  %v741_v29 = vld [vmem:[%s977_s0 + $0x20] ss:$12 sps:$4 sm:$0xff]  }
   0xb   :  { %602 = vmatpush3.bf16.msra.mxu0 %v712_v5  ;;  %701 = vmatpush3.bf16.msra.mxu1 %v712_v5  ;;  %v742_v30 = vld [vmem:[%s977_s0 + $0x4c] ss:$12 sps:$4 sm:$0xff]   ;;  %v745_v32 = vld [vmem:[%s977_s0 + $0x48] ss:$12 sps:$4 sm:$0xff]   ;;  %v746_v33 = vld [vmem:[%s977_s0 + $0x50] ss:$12 sps:$4 sm:$0xff]  }
   0xc   :  { %603 = vmatprep.subr.bf16.mxu0 %v713_v6  ;;  %694 = vmatprep.subr.bf16.mxu1 %v713_v6  ;;  %v744_v31 = vld [vmem:[%s977_s0 + $0x38] ss:$12 sps:$4 sm:$0xff]   ;;  %v749_v35 = vld [vmem:[%s977_s0 + $0x68] ss:$12 sps:$4 sm:$0xff]   ;;  %v750_v36 = vld [vmem:[%s977_s0 + $0x60] ss:$12 sps:$4 sm:$0xff]  }
   0xd   :  { %v747_v34 = vld [vmem:[%s977_s0 + $0x64] ss:$12 sps:$4 sm:$0xff]   ;;  %v751_v37 = vld [vmem:[%s977_s0 + $0x80] ss:$12 sps:$4 sm:$0xff]   ;;  %v752_v38 = vld [vmem:[%s977_s0 + $0x7c] ss:$12 sps:$4 sm:$0xff]  }
   0xe   :  { %v754_v39 = vld [vmem:[%s977_s0 + $0x98] ss:$12 sps:$4 sm:$0xff]   ;;  %v756_v41 = vld [vmem:[%s977_s0 + $0xb0] ss:$12 sps:$4 sm:$0xff]  }
   0xf   :  { %604 = vmatpush3.bf16.msra.mxu0 %v714_v7  ;;  %702 = vmatpush3.bf16.msra.mxu1 %v714_v7  ;;  %v755_v40 = vld [vmem:[%s977_s0 + $0x78] ss:$12 sps:$4 sm:$0xff]  }
  0x10   :  { %605 = vmatprep.subr.bf16.mxu0 %v715_v8  ;;  %695 = vmatprep.subr.bf16.mxu1 %v715_v8 }
  0x13   :  { %606 = vmatpush3.bf16.msra.mxu0 %v716_v9  ;;  %703 = vmatpush3.bf16.msra.mxu1 %v716_v9 }
  0x14   :  { %607 = vmatprep.subr.bf16.mxu0 %v717_v10  ;;  %696 = vmatprep.subr.bf16.mxu1 %v717_v10 }
  0x17   :  { %608 = vmatpush3.bf16.msra.mxu0 %v718_v13  ;;  %704 = vmatpush3.bf16.msra.mxu1 %v718_v13 }
  0x18   :  { %609 = vmatprep.subr.bf16.mxu0 %v719_v14  ;;  %697 = vmatprep.subr.bf16.mxu1 %v719_v14 }
  0x1b   :  { %610 = vmatpush3.bf16.msra.mxu0 %v720_v15  ;;  %705 = vmatpush3.bf16.msra.mxu1 %v720_v15 }
  0x1c   :  { %611 = vmatprep.subr.bf16.mxu0 %v721_v16  ;;  %698 = vmatprep.subr.bf16.mxu1 %v721_v16 }
  0x1f   :  { %612 = vmatpush3.bf16.msra.mxu0 %v722_v17  ;;  %706 = vmatpush3.bf16.msra.mxu1 %v722_v17 }
  0x20   :  { %671 = vmatprep.subr.bf16.mxu1 %v729_v19 }
  0x22   :  { %366 = vmatmul.mubr.bf16.vlgmr.msra.gmra.mrb[0].mxu0 %v723_v18  ;;  %414 = vmatmul.mubr.bf16.vlgmr.msra.gmra.mrb[0].mxu1 %v726_v20 }
  0x23   :  { %672 = vmatpush3.bf16.msra.mxu1 %v729_v19  ;;  %373 = vmatprep.mubr.bf16.mxu0 %v730_v21 }
  0x24   :  { %421 = vmatprep.mubr.bf16.mxu1 %v732_v22  ;;  %673 = vmatprep.subr.bf16.mxu1 %v736_v23 }
  0x27   :  { %674 = vmatpush3.bf16.msra.mxu1 %v736_v23 }
  0x2a   :  { %374 = vmatmul.mubr.bf16.gmra.mrb[4].mxu0 %v734_v24  ;;  %422 = vmatmul.mubr.bf16.gmra.mrb[4].mxu1 %v735_v25 }
  0x2b   :  { %381 = vmatprep.mubr.bf16.mxu0 %v737_v26  ;;  %675 = vmatprep.mubr.msk.bf16.mxu1 %vm308_vm0, %v739_v27 }
  0x32   :  { %382 = vmatmul.mubr.bf16.gmra.mrb[8].mxu0 %v740_v28  ;;  %676 = vmatmul.mubr.msk.bf16.vlgmr.msra.gmra.mrb[8].mxu1 %vm308_vm0, %v741_v29 }
  0x33   :  { %389 = vmatprep.mubr.bf16.mxu0 %v742_v30  ;;  %679 = vmatprep.mubr.msk.bf16.mxu1 %vm308_vm0, %v744_v31 }
  0x3a   :  { %390 = vmatmul.mubr.bf16.gmra.mrb[12].mxu0 %v745_v32  ;;  %680 = vmatmul.mubr.msk.bf16.gmra.mrb[12].mxu1 %vm308_vm0, %v746_v33 }
  0x3b   :  { %397 = vmatprep.mubr.bf16.mxu0 %v747_v34  ;;  %683 = vmatprep.mubr.msk.bf16.mxu1 %vm308_vm0, %v749_v35 }
  0x42   :  { %398 = vmatmul.mubr.bf16.gmra.mrb[16].mxu0 %v750_v36  ;;  %684 = vmatmul.mubr.msk.bf16.gmra.mrb[16].mxu1 %vm308_vm0, %v751_v37 }
  0x43   :  { %405 = vmatprep.mubr.bf16.mxu0 %v752_v38  ;;  %687 = vmatprep.mubr.msk.bf16.mxu1 %vm308_vm0, %v754_v39 }
  0x4a   :  { %406 = vmatmul.mubr.bf16.gmra.mrb[20].mxu0 %v755_v40  ;;  %688 = vmatmul.mubr.msk.bf16.gmra.mrb[20].mxu1 %vm308_vm0, %v756_v41 }
  0xf5   :  { %v613_v42 = vpop.f32.mrb[0].mxu0  ;;  %v649_v43 = vpop.f32.mrb[0].mxu1 }
  0xf6   :  { %v614_v44 = vpop.f32.mrb[1].mxu0  ;;  %v650_v45 = vpop.f32.mrb[1].mxu1 }
  0xf7   :  { %v615_v46 = vadd.f32 %v614_v44, %v613_v42  ;;  %v906_v47 = vadd.f32 %v650_v45, %v649_v43  ;;  %v616_v48 = vpop.f32.mrb[2].mxu0  ;;  %v652_v49 = vpop.f32.mrb[2].mxu1 }
  0xf8   :  { %v617_v50 = vpop.f32.mrb[3].mxu0  ;;  %v653_v51 = vpop.f32.mrb[3].mxu1 }
  0xf9   :  { %v618_v52 = vadd.f32 %v617_v50, %v616_v48  ;;  %v908_v53 = vadd.f32 %v653_v51, %v652_v49 }
  0xfd   :  { %v619_v54 = vpop.f32.mrb[4].mxu0  ;;  %v655_v55 = vpop.f32.mrb[4].mxu1 }
  0xfe   :  { %v620_v56 = vpop.f32.mrb[5].mxu0  ;;  %v656_v57 = vpop.f32.mrb[5].mxu1 }
  0xff   :  { %v621_v58 = vadd.f32 %v620_v56, %v619_v54  ;;  %v657_v59 = vadd.f32 %v656_v57, %v655_v55  ;;  %v622_v60 = vpop.f32.mrb[6].mxu0  ;;  %v658_v61 = vpop.f32.mrb[6].mxu1 }
 0x100   :  { %v623_v62 = vpop.f32.mrb[7].mxu0  ;;  %v659_v63 = vpop.f32.mrb[7].mxu1 }
 0x101   :  { %v624_v0 = vadd.f32 %v623_v62, %v622_v60  ;;  %v660_v1 = vadd.f32 %v659_v63, %v658_v61 }
 0x105   :  { %v625_v2 = vpop.f32.mrb[8].mxu0  ;;  %v677_v3 = vpop.f32.mrb[8].mxu1 }
 0x106   :  { %v473_v4 = vadd.f32 %v677_v3, %v621_v58  ;;  %v626_v5 = vpop.f32.mrb[9].mxu0  ;;  %v464_v6 = vpop.f32.mrb[9].mxu1 }
 0x107   :  { %v627_v7 = vadd.f32 %v626_v5, %v625_v2  ;;  %v465_v8 = vadd.f32 %v615_v46, %v464_v6  ;;  %v628_v9 = vpop.f32.mrb[10].mxu0  ;;  %v678_v10 = vpop.f32.mrb[10].mxu1 }
 0x108   :  { %529 = vst.msk [vmem:[%s978_s2 + $0x10] sm:$0xff] %vm308_vm0, %v473_v4  ;;  %v476_v11 = vadd.f32 %v678_v10, %v624_v0  ;;  %v629_v12 = vpop.f32.mrb[11].mxu0  ;;  %v467_v13 = vpop.f32.mrb[11].mxu1 }
 0x109   :  { %527 = vst.msk [vmem:[%s978_s2] sm:$0xff] %vm308_vm0, %v465_v8  ;;  %v630_v14 = vadd.f32 %v629_v12, %v628_v9  ;;  %v468_v15 = vadd.f32 %v618_v52, %v467_v13 }
 0x10a   :  { %530 = vst.msk [vmem:[%s978_s2 + $0x18] sm:$0xff] %vm308_vm0, %v476_v11 }
 0x10b   :  { %528 = vst.msk [vmem:[%s978_s2 + $0x8] sm:$0xff] %vm308_vm0, %v468_v15 }
 0x10d   :  { %v631_v16 = vpop.f32.mrb[12].mxu0  ;;  %v681_v17 = vpop.f32.mrb[12].mxu1 }
 0x10e   :  { %v632_v18 = vpop.f32.mrb[13].mxu0  ;;  %v480_v19 = vpop.f32.mrb[13].mxu1 }
 0x10f   :  { %v633_v20 = vadd.f32 %v632_v18, %v631_v16  ;;  %v481_v21 = vadd.f32 %v627_v7, %v480_v19  ;;  %v634_v22 = vpop.f32.mrb[14].mxu0  ;;  %v682_v23 = vpop.f32.mrb[14].mxu1 }
 0x110   :  { %v635_v24 = vpop.f32.mrb[15].mxu0  ;;  %v483_v25 = vpop.f32.mrb[15].mxu1 }
 0x111   :  { %v489_v26 = vadd.f32 %v681_v17, %v633_v20  ;;  %531 = vst.msk [vmem:[%s978_s2 + $0x20] sm:$0xff] %vm308_vm0, %v481_v21  ;;  %v636_v27 = vadd.f32 %v635_v24, %v634_v22  ;;  %v484_v28 = vadd.f32 %v630_v14, %v483_v25 }
 0x113   :  { %533 = vst.msk [vmem:[%s978_s2 + $0x30] sm:$0xff] %vm308_vm0, %v489_v26  ;;  %v492_v29 = vadd.f32 %v682_v23, %v636_v27  ;;  %532 = vst.msk [vmem:[%s978_s2 + $0x28] sm:$0xff] %vm308_vm0, %v484_v28 }
 0x115   :  { %534 = vst.msk [vmem:[%s978_s2 + $0x38] sm:$0xff] %vm308_vm0, %v492_v29  ;;  %v637_v30 = vpop.f32.mrb[16].mxu0  ;;  %v685_v31 = vpop.f32.mrb[16].mxu1 }
 0x116   :  { %v638_v32 = vpop.f32.mrb[17].mxu0  ;;  %v496_v33 = vpop.f32.mrb[17].mxu1 }
 0x117   :  { %v639_v34 = vadd.f32 %v638_v32, %v637_v30  ;;  %v640_v35 = vpop.f32.mrb[18].mxu0  ;;  %v686_v36 = vpop.f32.mrb[18].mxu1 }
 0x118   :  { %v641_v37 = vpop.f32.mrb[19].mxu0  ;;  %v499_v38 = vpop.f32.mrb[19].mxu1 }
 0x119   :  { %v497_v39 = vadd.f32 %v639_v34, %v496_v33  ;;  %v642_v40 = vadd.f32 %v641_v37, %v640_v35 }
 0x11b   :  { %535 = vst.msk [vmem:[%s978_s2 + $0x40] sm:$0xff] %vm308_vm0, %v497_v39  ;;  %v500_v41 = vadd.f32 %v642_v40, %v499_v38 }
 0x11d   :  { %536 = vst.msk [vmem:[%s978_s2 + $0x48] sm:$0xff] %vm308_vm0, %v500_v41  ;;  %v643_v42 = vpop.f32.mrb[20].mxu0  ;;  %v689_v43 = vpop.f32.mrb[20].mxu1 }
 0x11e   :  { %v521_v44 = vadd.f32 %v689_v43, %v657_v59  ;;  %v644_v45 = vpop.f32.mrb[21].mxu0  ;;  %v512_v46 = vpop.f32.mrb[21].mxu1 }
 0x11f   :  { %v645_v48 = vadd.f32 %v644_v45, %v643_v42  ;;  %v513_v49 = vadd.f32 %v906_v47, %v512_v46  ;;  %v646_v50 = vpop.f32.mrb[22].mxu0  ;;  %v690_v51 = vpop.f32.mrb[22].mxu1 }
 0x120   :  { %541 = vst.msk [vmem:[%s978_s2 + $0x70] sm:$0xff] %vm308_vm0, %v521_v44  ;;  %v524_v52 = vadd.f32 %v690_v51, %v660_v1  ;;  %v647_v54 = vpop.f32.mrb[23].mxu0  ;;  %v515_v55 = vpop.f32.mrb[23].mxu1 }
 0x121   :  { %v505_v56 = vadd.f32 %v685_v31, %v645_v48  ;;  %539 = vst.msk [vmem:[%s978_s2 + $0x60] sm:$0xff] %vm308_vm0, %v513_v49  ;;  %v648_v57 = vadd.f32 %v647_v54, %v646_v50  ;;  %v516_v58 = vadd.f32 %v908_v53, %v515_v55 }
 0x122   :  { %542 = vst.msk [vmem:[%s978_s2 + $0x78] sm:$0xff] %vm308_vm0, %v524_v52 }
 0x123   :  { %537 = vst.msk [vmem:[%s978_s2 + $0x50] sm:$0xff] %vm308_vm0, %v505_v56  ;;  %v508_v47 = vadd.f32 %v686_v36, %v648_v57  ;;  %540 = vst.msk [vmem:[%s978_s2 + $0x68] sm:$0xff] %vm308_vm0, %v516_v58 }
 0x125   :  { %538 = vst.msk [vmem:[%s978_s2 + $0x58] sm:$0xff] %vm308_vm0, %v508_v47 }

// kernel: feature_extraction.7
= control target key start
LH: loop header
LB: loop body
LE: loop exit
PB: predicated region body
PF: predicated region fallthrough
CT: control target
= control target key end

     0   :  { %s986_s0 = inlined_call_operand.vmem [shape: bf16[128,288], index: 0, kind: input, shape index: {}]   ;;  %s987_s1 = inlined_call_operand.vmem [shape: bf16[288,32], index: 1, kind: input, shape index: {}]   ;;  %s988_s2 = inlined_call_operand.hbm [shape: f32[128,32], index: 2, kind: output, shape index: {}]  }
   0x1   :  { %v723_v0 = vld [vmem:[%s987_s1 + $0x40] sm:$0xff]   ;;  %v725_v2 = vld [vmem:[%s987_s1 + $0x48] sm:$0xff]   ;;  %v727_v4 = vld [vmem:[%s987_s1 + $0x50] sm:$0xff]  }
   0x2   :  { %v724_v1 = vld [vmem:[%s987_s1] sm:$0xff]   ;;  %610 = vmatprep.subr.bf16.mxu0 %v723_v0  ;;  %704 = vmatprep.subr.bf16.mxu1 %v723_v0  ;;  %v726_v3 = vld [vmem:[%s987_s1 + $0x8] sm:$0xff]   ;;  %v728_v5 = vld [vmem:[%s987_s1 + $0x10] sm:$0xff]  }
   0x3   :  { %611 = vmatpush3.bf16.msra.mxu0 %v724_v1  ;;  %712 = vmatpush3.bf16.msra.mxu1 %v724_v1  ;;  %v729_v6 = vld [vmem:[%s987_s1 + $0x58] sm:$0xff]   ;;  %v731_v8 = vld [vmem:[%s987_s1 + $0x60] sm:$0xff]   ;;  %v733_v10 = vld [vmem:[%s987_s1 + $0x68] sm:$0xff]  }
   0x4   :  { %612 = vmatprep.subr.bf16.mxu0 %v725_v2  ;;  %705 = vmatprep.subr.bf16.mxu1 %v725_v2  ;;  %v730_v7 = vld [vmem:[%s987_s1 + $0x18] sm:$0xff]   ;;  %v732_v9 = vld [vmem:[%s987_s1 + $0x20] sm:$0xff]   ;;  %v734_v13 = vld [vmem:[%s987_s1 + $0x28] sm:$0xff]  }
   0x5   :  { %v741_v11 = vld [vmem:[%s986_s0 + $0x4] ss:$12 sps:$4 sm:$0xff]   ;;  %v744_v12 = vld [vmem:[%s986_s0 + $0x94] ss:$12 sps:$4 sm:$0xff]   ;;  %v737_v16 = vld [vmem:[%s987_s1 + $0x78] sm:$0xff]  }
   0x6   :  { %v735_v14 = vld [vmem:[%s987_s1 + $0x70] sm:$0xff]   ;;  %366 = vmatprep.mubr.bf16.mxu0 %v741_v11  ;;  %414 = vmatprep.mubr.bf16.mxu1 %v744_v12  ;;  %v738_v17 = vld [vmem:[%s987_s1 + $0x38] sm:$0xff]   ;;  %v739_v18 = vld [vmem:[%s986_s0] ss:$12 sps:$4 sm:$0xff]  }
   0x7   :  { %613 = vmatpush3.bf16.msra.mxu0 %v726_v3  ;;  %713 = vmatpush3.bf16.msra.mxu1 %v726_v3  ;;  %v736_v15 = vld [vmem:[%s987_s1 + $0x30] sm:$0xff]   ;;  %v745_v19 = vld [vmem:[%s987_s1 + $0x80] sm:$0xff]   ;;  %v746_v21 = vld [vmem:[%s986_s0 + $0x1c] ss:$12 sps:$4 sm:$0xff]  }
   0x8   :  { %614 = vmatprep.subr.bf16.mxu0 %v727_v4  ;;  %706 = vmatprep.subr.bf16.mxu1 %v727_v4  ;;  %v742_v20 = vld [vmem:[%s986_s0 + $0x90] ss:$12 sps:$4 sm:$0xff]   ;;  %v748_v22 = vld [vmem:[%s986_s0 + $0xac] ss:$12 sps:$4 sm:$0xff]  }
   0x9   :  { %v752_v23 = vld [vmem:[%s987_s1 + $0x88] sm:$0xff]  }
   0xb   :  { %615 = vmatpush3.bf16.msra.mxu0 %v728_v5  ;;  %714 = vmatpush3.bf16.msra.mxu1 %v728_v5 }
   0xc   :  { %616 = vmatprep.subr.bf16.mxu0 %v729_v6  ;;  %707 = vmatprep.subr.bf16.mxu1 %v729_v6 }
   0xf   :  { %617 = vmatpush3.bf16.msra.mxu0 %v730_v7  ;;  %715 = vmatpush3.bf16.msra.mxu1 %v730_v7 }
  0x10   :  { %618 = vmatprep.subr.bf16.mxu0 %v731_v8  ;;  %708 = vmatprep.subr.bf16.mxu1 %v731_v8 }
  0x13   :  { %619 = vmatpush3.bf16.msra.mxu0 %v732_v9  ;;  %716 = vmatpush3.bf16.msra.mxu1 %v732_v9 }
  0x14   :  { %620 = vmatprep.subr.bf16.mxu0 %v733_v10  ;;  %709 = vmatprep.subr.bf16.mxu1 %v733_v10 }
  0x17   :  { %621 = vmatpush3.bf16.msra.mxu0 %v734_v13  ;;  %717 = vmatpush3.bf16.msra.mxu1 %v734_v13 }
  0x18   :  { %622 = vmatprep.subr.bf16.mxu0 %v735_v14  ;;  %710 = vmatprep.subr.bf16.mxu1 %v735_v14 }
  0x1b   :  { %623 = vmatpush3.bf16.msra.mxu0 %v736_v15  ;;  %718 = vmatpush3.bf16.msra.mxu1 %v736_v15 }
  0x1c   :  { %624 = vmatprep.subr.bf16.mxu0 %v737_v16  ;;  %711 = vmatprep.subr.bf16.mxu1 %v737_v16 }
  0x1f   :  { %625 = vmatpush3.bf16.msra.mxu0 %v738_v17  ;;  %719 = vmatpush3.bf16.msra.mxu1 %v738_v17 }
  0x20   :  { %684 = vmatprep.subr.bf16.mxu1 %v745_v19 }
  0x22   :  { %367 = vmatmul.mubr.bf16.vlgmr.msra.gmra.mrb[0].mxu0 %v739_v18  ;;  %415 = vmatmul.mubr.bf16.vlgmr.msra.gmra.mrb[0].mxu1 %v742_v20 }
  0x23   :  { %685 = vmatpush3.bf16.msra.mxu1 %v745_v19  ;;  %374 = vmatprep.mubr.bf16.mxu0 %v746_v21 }
  0x24   :  { %422 = vmatprep.mubr.bf16.mxu1 %v748_v22  ;;  %686 = vmatprep.subr.bf16.mxu1 %v752_v23 }
  0x25   :  { %7 = vsyncpa [#allocation3], 0  ;;  %v750_v24 = vld [vmem:[%s986_s0 + $0x18] ss:$12 sps:$4 sm:$0xff]   ;;  %v751_v25 = vld [vmem:[%s986_s0 + $0xa8] ss:$12 sps:$4 sm:$0xff]  }
  0x26   :  { %v753_v26 = vld [vmem:[%s986_s0 + $0x34] ss:$12 sps:$4 sm:$0xff]   ;;  %vm309_vm0 = vcmask 261120   ;;  %v756_v28 = vld [vmem:[%s986_s0 + $0x30] ss:$12 sps:$4 sm:$0xff]  }
  0x27   :  { %687 = vmatpush3.bf16.msra.mxu1 %v752_v23  ;;  %v755_v27 = vld [vmem:[%s986_s0 + $0x8] ss:$12 sps:$4 sm:$0xff]   ;;  %v757_v29 = vld [vmem:[%s986_s0 + $0x20] ss:$12 sps:$4 sm:$0xff]   ;;  %v760_v31 = vld [vmem:[%s986_s0 + $0x38] ss:$12 sps:$4 sm:$0xff]  }
  0x28   :  { %v758_v30 = vld [vmem:[%s986_s0 + $0x4c] ss:$12 sps:$4 sm:$0xff]   ;;  %v761_v32 = vld [vmem:[%s986_s0 + $0x48] ss:$12 sps:$4 sm:$0xff]   ;;  %v762_v33 = vld [vmem:[%s986_s0 + $0x50] ss:$12 sps:$4 sm:$0xff]  }
  0x29   :  { %v763_v34 = vld [vmem:[%s986_s0 + $0x64] ss:$12 sps:$4 sm:$0xff]   ;;  %v765_v35 = vld [vmem:[%s986_s0 + $0x68] ss:$12 sps:$4 sm:$0xff]   ;;  %v766_v36 = vld [vmem:[%s986_s0 + $0x60] ss:$12 sps:$4 sm:$0xff]  }
  0x2a   :  { %375 = vmatmul.mubr.bf16.gmra.mrb[4].mxu0 %v750_v24  ;;  %423 = vmatmul.mubr.bf16.gmra.mrb[4].mxu1 %v751_v25  ;;  %v767_v37 = vld [vmem:[%s986_s0 + $0x80] ss:$12 sps:$4 sm:$0xff]   ;;  %v768_v38 = vld [vmem:[%s986_s0 + $0x7c] ss:$12 sps:$4 sm:$0xff]   ;;  %v770_v39 = vld [vmem:[%s986_s0 + $0x98] ss:$12 sps:$4 sm:$0xff]  }
  0x2b   :  { %382 = vmatprep.mubr.bf16.mxu0 %v753_v26  ;;  %688 = vmatprep.mubr.msk.bf16.mxu1 %vm309_vm0, %v755_v27  ;;  %v771_v40 = vld [vmem:[%s986_s0 + $0x78] ss:$12 sps:$4 sm:$0xff]   ;;  %v772_v41 = vld [vmem:[%s986_s0 + $0xb0] ss:$12 sps:$4 sm:$0xff]   ;;  %s797_s0 = smov [#allocation2]  }
  0x2c   :  { %s549_s7 = sshll.u32 %s797_s0, 4  ;;  %s550_s7 = int_to_ptr.vmem [resolvable:$true] %s549_s7 }
  0x2d   :  { %s773_s8 = scalar_lea.vmem %s550_s7, 2048  ;;  %p778_p1 = scmp.lt.s32.totalorder %s550_s7, %s550_s7 }
  0x2e   :  { %p774_p0 = scmp.ne.s32.totalorder %s550_s7, %s773_s8  ;;  %p779_p2 = scmp.lt.s32.totalorder %s773_s8, %s773_s8 }
  0x30   :  { %p780_p3 = por %p779_p2, %p778_p1 }
  0x32   :  { %383 = vmatmul.mubr.bf16.gmra.mrb[8].mxu0 %v756_v28  ;;  %689 = vmatmul.mubr.msk.bf16.vlgmr.msra.gmra.mrb[8].mxu1 %vm309_vm0, %v757_v29  ;;  %p781_p4 = pnand %p780_p3, %p774_p0 }
  0x33   :  { %390 = vmatprep.mubr.bf16.mxu0 %v758_v30  ;;  %692 = vmatprep.mubr.msk.bf16.mxu1 %vm309_vm0, %v760_v31 }
  0x3a   :  { %391 = vmatmul.mubr.bf16.gmra.mrb[12].mxu0 %v761_v32  ;;  %693 = vmatmul.mubr.msk.bf16.gmra.mrb[12].mxu1 %vm309_vm0, %v762_v33 }
  0x3b   :  { %398 = vmatprep.mubr.bf16.mxu0 %v763_v34  ;;  %696 = vmatprep.mubr.msk.bf16.mxu1 %vm309_vm0, %v765_v35 }
  0x42   :  { %399 = vmatmul.mubr.bf16.gmra.mrb[16].mxu0 %v766_v36  ;;  %697 = vmatmul.mubr.msk.bf16.gmra.mrb[16].mxu1 %vm309_vm0, %v767_v37 }
  0x43   :  { %406 = vmatprep.mubr.bf16.mxu0 %v768_v38  ;;  %700 = vmatprep.mubr.msk.bf16.mxu1 %vm309_vm0, %v770_v39 }
  0x4a   :  { %407 = vmatmul.mubr.bf16.gmra.mrb[20].mxu0 %v771_v40  ;;  %701 = vmatmul.mubr.msk.bf16.gmra.mrb[20].mxu1 %vm309_vm0, %v772_v41 }
  0xf5   :  { %v626_v42 = vpop.f32.mrb[0].mxu0  ;;  %v662_v43 = vpop.f32.mrb[0].mxu1 }
  0xf6   :  { %v627_v44 = vpop.f32.mrb[1].mxu0  ;;  %v663_v45 = vpop.f32.mrb[1].mxu1 }
  0xf7   :  { %v628_v46 = vadd.f32 %v627_v44, %v626_v42  ;;  %v949_v47 = vadd.f32 %v663_v45, %v662_v43  ;;  %v629_v48 = vpop.f32.mrb[2].mxu0  ;;  %v665_v49 = vpop.f32.mrb[2].mxu1 }
  0xf8   :  { %v630_v50 = vpop.f32.mrb[3].mxu0  ;;  %v666_v51 = vpop.f32.mrb[3].mxu1 }
  0xf9   :  { %v631_v52 = vadd.f32 %v630_v50, %v629_v48  ;;  %v951_v53 = vadd.f32 %v666_v51, %v665_v49 }
  0xfd   :  { %v632_v54 = vpop.f32.mrb[4].mxu0  ;;  %v668_v55 = vpop.f32.mrb[4].mxu1 }
  0xfe   :  { %v633_v56 = vpop.f32.mrb[5].mxu0  ;;  %v669_v57 = vpop.f32.mrb[5].mxu1 }
  0xff   :  { %v634_v58 = vadd.f32 %v633_v56, %v632_v54  ;;  %v670_v59 = vadd.f32 %v669_v57, %v668_v55  ;;  %v635_v60 = vpop.f32.mrb[6].mxu0  ;;  %v671_v61 = vpop.f32.mrb[6].mxu1 }
 0x100   :  { %v636_v62 = vpop.f32.mrb[7].mxu0  ;;  %v672_v63 = vpop.f32.mrb[7].mxu1 }
 0x101   :  { %v637_v0 = vadd.f32 %v636_v62, %v635_v60  ;;  %v953_v1 = vadd.f32 %v672_v63, %v671_v61 }
 0x105   :  { %v638_v2 = vpop.f32.mrb[8].mxu0  ;;  %v690_v3 = vpop.f32.mrb[8].mxu1 }
 0x106   :  { %v474_v4 = vadd.f32 %v690_v3, %v634_v58  ;;  %v639_v5 = vpop.f32.mrb[9].mxu0  ;;  %v465_v6 = vpop.f32.mrb[9].mxu1 }
 0x107   :  { %v640_v7 = vadd.f32 %v639_v5, %v638_v2  ;;  %v466_v8 = vadd.f32 %v628_v46, %v465_v6  ;;  %v641_v9 = vpop.f32.mrb[10].mxu0  ;;  %v691_v10 = vpop.f32.mrb[10].mxu1 }
 0x108   :  { %530 = vst.msk [vmem:[#allocation2 + $0x10] sm:$0xff] %vm309_vm0, %v474_v4  ;;  %v477_v11 = vadd.f32 %v691_v10, %v637_v0  ;;  %v642_v12 = vpop.f32.mrb[11].mxu0  ;;  %v468_v13 = vpop.f32.mrb[11].mxu1 }
 0x109   :  { %528 = vst.msk [vmem:[#allocation2] sm:$0xff] %vm309_vm0, %v466_v8  ;;  %v643_v14 = vadd.f32 %v642_v12, %v641_v9  ;;  %v469_v15 = vadd.f32 %v631_v52, %v468_v13 }
 0x10a   :  { %531 = vst.msk [vmem:[#allocation2 + $0x18] sm:$0xff] %vm309_vm0, %v477_v11 }
 0x10b   :  { %529 = vst.msk [vmem:[#allocation2 + $0x8] sm:$0xff] %vm309_vm0, %v469_v15 }
 0x10d   :  { %v644_v16 = vpop.f32.mrb[12].mxu0  ;;  %v694_v17 = vpop.f32.mrb[12].mxu1 }
 0x10e   :  { %v645_v18 = vpop.f32.mrb[13].mxu0  ;;  %v481_v19 = vpop.f32.mrb[13].mxu1 }
 0x10f   :  { %v646_v20 = vadd.f32 %v645_v18, %v644_v16  ;;  %v482_v21 = vadd.f32 %v640_v7, %v481_v19  ;;  %v647_v22 = vpop.f32.mrb[14].mxu0  ;;  %v695_v23 = vpop.f32.mrb[14].mxu1 }
 0x110   :  { %v648_v24 = vpop.f32.mrb[15].mxu0  ;;  %v484_v25 = vpop.f32.mrb[15].mxu1 }
 0x111   :  { %v490_v26 = vadd.f32 %v694_v17, %v646_v20  ;;  %532 = vst.msk [vmem:[#allocation2 + $0x20] sm:$0xff] %vm309_vm0, %v482_v21  ;;  %v649_v27 = vadd.f32 %v648_v24, %v647_v22  ;;  %v485_v28 = vadd.f32 %v643_v14, %v484_v25 }
 0x113   :  { %534 = vst.msk [vmem:[#allocation2 + $0x30] sm:$0xff] %vm309_vm0, %v490_v26  ;;  %v493_v29 = vadd.f32 %v695_v23, %v649_v27  ;;  %533 = vst.msk [vmem:[#allocation2 + $0x28] sm:$0xff] %vm309_vm0, %v485_v28 }
 0x115   :  { %535 = vst.msk [vmem:[#allocation2 + $0x38] sm:$0xff] %vm309_vm0, %v493_v29  ;;  %v650_v30 = vpop.f32.mrb[16].mxu0  ;;  %v698_v31 = vpop.f32.mrb[16].mxu1 }
 0x116   :  { %v651_v32 = vpop.f32.mrb[17].mxu0  ;;  %v497_v33 = vpop.f32.mrb[17].mxu1 }
 0x117   :  { %v652_v34 = vadd.f32 %v651_v32, %v650_v30  ;;  %v653_v35 = vpop.f32.mrb[18].mxu0  ;;  %v699_v36 = vpop.f32.mrb[18].mxu1 }
 0x118   :  { %v654_v37 = vpop.f32.mrb[19].mxu0  ;;  %v500_v38 = vpop.f32.mrb[19].mxu1 }
 0x119   :  { %v498_v39 = vadd.f32 %v652_v34, %v497_v33  ;;  %v655_v40 = vadd.f32 %v654_v37, %v653_v35 }
 0x11b   :  { %536 = vst.msk [vmem:[#allocation2 + $0x40] sm:$0xff] %vm309_vm0, %v498_v39  ;;  %v501_v41 = vadd.f32 %v655_v40, %v500_v38 }
 0x11d   :  { %537 = vst.msk [vmem:[#allocation2 + $0x48] sm:$0xff] %vm309_vm0, %v501_v41  ;;  %v656_v42 = vpop.f32.mrb[20].mxu0  ;;  %v702_v43 = vpop.f32.mrb[20].mxu1 }
 0x11e   :  { %v522_v44 = vadd.f32 %v702_v43, %v670_v59  ;;  %v657_v45 = vpop.f32.mrb[21].mxu0  ;;  %v513_v46 = vpop.f32.mrb[21].mxu1 }
 0x11f   :  { %v658_v48 = vadd.f32 %v657_v45, %v656_v42  ;;  %v514_v49 = vadd.f32 %v949_v47, %v513_v46  ;;  %v659_v50 = vpop.f32.mrb[22].mxu0  ;;  %v703_v51 = vpop.f32.mrb[22].mxu1 }
 0x120   :  { %542 = vst.msk [vmem:[#allocation2 + $0x70] sm:$0xff] %vm309_vm0, %v522_v44  ;;  %v525_v52 = vadd.f32 %v703_v51, %v953_v1  ;;  %v660_v54 = vpop.f32.mrb[23].mxu0  ;;  %v516_v55 = vpop.f32.mrb[23].mxu1 }
 0x121   :  { %v506_v56 = vadd.f32 %v698_v31, %v658_v48  ;;  %540 = vst.msk [vmem:[#allocation2 + $0x60] sm:$0xff] %vm309_vm0, %v514_v49  ;;  %v661_v57 = vadd.f32 %v660_v54, %v659_v50  ;;  %v517_v58 = vadd.f32 %v951_v53, %v516_v55 }
 0x122   :  { %543 = vst.msk [vmem:[#allocation2 + $0x78] sm:$0xff] %vm309_vm0, %v525_v52 }
 0x123   :  { %538 = vst.msk [vmem:[#allocation2 + $0x50] sm:$0xff] %vm309_vm0, %v506_v56  ;;  %v509_v47 = vadd.f32 %v699_v36, %v661_v57  ;;  %541 = vst.msk [vmem:[#allocation2 + $0x68] sm:$0xff] %vm309_vm0, %v517_v58 }
 0x125   :  { %539 = vst.msk [vmem:[#allocation2 + $0x58] sm:$0xff] %vm309_vm0, %v509_v47 }
 0x126   :  { %784 = shalt.err (!%p781_p4)
}
 0x127   :  { %s785_s11 = scalar_lea.hbm %s988_s2, 2048 }
 0x128   :  { %p786_p5 = scmp.ne.s32.totalorder %s988_s2, %s785_s11  ;;  %p789_p6 = scmp.lt.u32.totalorder %s785_s11, %s988_s2 }
 0x12a   :  { %p791_p7 = pnand %p789_p6, %p786_p5 }
 0x12c   :  { %794 = shalt.err (!%p791_p7)
}
 0x12d   :  { %s798_s16 = smov 128   ;;  %s799_s17 = smov 8  }
 0x12e   :  { %555 = dma.vmem_to_hbm [thread:$0]  %s550_s7, 2048, %s988_s2, [#allocation3], %s798_s16, %s798_s16, %s799_s17  }
 0x12f   :  { %795 = dma.done.wait [#allocation3], 2048  }
 0x130   :  { %796 = vsyncadd [#allocation3], 4294965248 }
 0x131   :  { %559 = vsyncpa [#allocation3], 1 }

</bundles_post_ra>
